<compile_context>
chip_gen: v7x
topology: tpu7x:2x2x1
jax: 0.10.0
libtpu: 0.0.40
codegen_flags: <defaults>
</compile_context>

<pallas_src>
import functools

import jax
import jax.numpy as jnp
from jax.experimental import pallas as pl
from jax.experimental.pallas import tpu as pltpu

HIDDEN = 10            # true hidden width of the PyTorch model
OUT = 1
LANE = 128
H_PAD = 128            # hidden padded to one full lane group (zero columns)
DEFAULT_TILE_N = 4096  # requested rows per grid step (see _choose_tile_n)


def _ltr_kernel(x_ref, w1_ref, b1_ref, w2_ref, b2_ref, o_ref):
    # x_ref : (tile_n, F)           VMEM  f32   (streamed, double-buffered)
    # w1_ref: (F, H_PAD)            VMEM  bf16  (grid-resident)
    # b1_ref: (1, H_PAD)            VMEM  f32   (grid-resident)
    # w2_ref: (1, H_PAD)            VMEM  f32   (grid-resident)
    # b2_ref: (1, 1)                SMEM  f32
    # o_ref : (tile_n//128, 128)    VMEM  f32   (lane-dense output slab)
    #
    # Cast x to bf16 inside the kernel (no wrapper-side HBM round trip of a
    # bf16 copy); the MXU accumulates in f32 regardless.
    x_bf = x_ref[...].astype(jnp.bfloat16)
    h = jnp.dot(x_bf, w1_ref[...], preferred_element_type=jnp.float32)
    h = jnp.maximum(h + b1_ref[...], 0.0)                 # (tile_n, H_PAD) f32

    tile_n = h.shape[0]
    # Leading-dim split only (tile_n//128 is a multiple of 8 -> layout-friendly).
    h3 = h.reshape(tile_n // LANE, LANE, H_PAD)
    w2 = w2_ref[...].reshape(1, 1, H_PAD)
    # Layer 2 as a VPU multiply + lane reduction (avoids a K=10, N=1 MXU op).
    y = jnp.sum(h3 * w2, axis=-1) + b2_ref[0, 0]          # (tile_n//128, 128)
    o_ref[...] = y.astype(o_ref.dtype)


def _choose_tile_n(n, requested):
    """Row tile: multiple of 1024 (sublane-aligned output block), <= requested,
    >= 1024; shrunk so the grid keeps >= 2 steps when the batch allows it
    (v7x megacore sharding)."""
    t = max(1024, (int(requested) // 1024) * 1024)
    while t > 1024 and -(-n // t) < 2:
        t -= 1024
    return t


def _vmem_limit_bytes(tile_n, f):
    """Scoped-VMEM budget from the actual tile footprint.  A (tile_n, f) f32
    tile is lane-padded to 128 lanes in VMEM; inputs/outputs are double
    buffered; h and the h*w2 product are tile-sized f32 temporaries.  2x
    headroom, capped at 56 MiB to stay inside v7x's 64 MiB physical VMEM."""
    f_lanes = -(-f // LANE) * LANE
    x_tile = tile_n * f_lanes * 4                  # f32 x tile, per buffer
    out_tile = tile_n * 4                          # (tile_n//128,128) f32, per buffer
    params = f_lanes * H_PAD * 2 + 3 * H_PAD * 4   # w1 bf16 + b1/w2 f32 (b2 in SMEM)
    temps = 2 * tile_n * H_PAD * 4                 # h and h*w2 f32 temporaries
    need = 2 * x_tile + 2 * out_tile + 2 * params + temps
    return int(min(max(2 * need, 16 << 20), 56 << 20))


@functools.partial(jax.jit, static_argnames=("tile_n",))
def ltr_forward(x, w1, b1, w2, b2, *, tile_n=DEFAULT_TILE_N):
    """relu(x @ w1 + b1) @ w2 + b2, returned as (N, 1) float32."""
    n, f = x.shape
    tn = _choose_tile_n(n, tile_n)
    num_tiles = -(-n // tn)
    n_pad = num_tiles * tn
    out_rows = n_pad // LANE

    # Normalize parameter shapes; pad the tiny hidden dim (10) to a full lane
    # group (128).  Params are grid-resident in VMEM, so this costs no per-tile
    # HBM bandwidth.
    w1 = jnp.asarray(w1, jnp.float32).reshape(f, HIDDEN)
    b1 = jnp.asarray(b1, jnp.float32).reshape(1, HIDDEN)
    w2 = jnp.asarray(w2, jnp.float32).reshape(HIDDEN, OUT)
    b2 = jnp.asarray(b2, jnp.float32).reshape(1, 1)

    w1p = jnp.zeros((f, H_PAD), jnp.float32).at[:, :HIDDEN].set(w1)
    w1p = w1p.astype(jnp.bfloat16)
    b1p = jnp.zeros((1, H_PAD), jnp.float32).at[:, :HIDDEN].set(b1)
    w2p = jnp.zeros((1, H_PAD), jnp.float32).at[:, :HIDDEN].set(w2[:, 0][None, :])

    cost = pl.CostEstimate(
        flops=2 * n_pad * f * H_PAD + 4 * n_pad * H_PAD,
        transcendentals=0,
        bytes_accessed=(n * f * 4 + out_rows * LANE * 4
                        + w1p.size * 2 + 3 * H_PAD * 4),
    )

    out = pl.pallas_call(
        _ltr_kernel,
        out_shape=jax.ShapeDtypeStruct((out_rows, LANE), jnp.float32),
        grid_spec=pltpu.PrefetchScalarGridSpec(
            num_scalar_prefetch=0,
            grid=(num_tiles,),
            in_specs=[
                # x streams in its native f32; the last block may read past row
                # n (undefined rows) -- those outputs are sliced off below.
                pl.BlockSpec((tn, f), lambda i: (i, 0)),
                pl.BlockSpec((f, H_PAD), lambda i: (0, 0)),          # w1 (resident)
                pl.BlockSpec((1, H_PAD), lambda i: (0, 0)),          # b1 (resident)
                pl.BlockSpec((1, H_PAD), lambda i: (0, 0)),          # w2 row
                pl.BlockSpec(memory_space=pltpu.MemorySpace.SMEM),   # b2 scalar
            ],
            out_specs=pl.BlockSpec((tn // LANE, LANE), lambda i: (i, 0)),
        ),
        compiler_params=pltpu.CompilerParams(
            dimension_semantics=("parallel",),
            vmem_limit_bytes=_vmem_limit_bytes(tn, f),
        ),
        cost_estimate=cost,
    )(x.astype(jnp.float32), w1p, b1p, w2p, b2)

    # Lane-dense (n_pad//128, 128) slab -> (N, 1); pure layout plumbing in XLA.
    # Keep the [:n] slice: it discards the undefined rows of the partial block.
    return out.reshape(n_pad, 1)[:n]


def init_params(key, num_features):
    """Deterministic init mimicking nn.Linear defaults: U(-1/sqrt(fan_in), +)."""
    k1, k2, k3, k4 = jax.random.split(key, 4)
    bound1 = 1.0 / jnp.sqrt(num_features)
    bound2 = 1.0 / jnp.sqrt(HIDDEN)
    w1 = jax.random.uniform(k1, (num_features, HIDDEN), jnp.float32, -bound1, bound1)
    b1 = jax.random.uniform(k2, (1, HIDDEN), jnp.float32, -bound1, bound1)
    w2 = jax.random.uniform(k3, (HIDDEN, OUT), jnp.float32, -bound2, bound2)
    b2 = jax.random.uniform(k4, (1, OUT), jnp.float32, -bound2, bound2)
    return w1, b1, w2, b2


if __name__ == "__main__":
    key = jax.random.PRNGKey(0)
    kx, kp = jax.random.split(key)

    # Ragged N on purpose (not a multiple of the row tile): handled by a
    # partial last block, with no wrapper-side padding copy of x.
    N, NUM_FEATURES = 1000, 32
    x = jax.random.normal(kx, (N, NUM_FEATURES), dtype=jnp.float32)
    w1, b1, w2, b2 = init_params(kp, NUM_FEATURES)

    out = jax.block_until_ready(ltr_forward(x, w1, b1, w2, b2))
    assert out.shape == (N, 1), out.shape

    # Tight check against a reference with the same bf16 rounding the kernel
    # applies before the MXU dot.
    xb = x.astype(jnp.bfloat16).astype(jnp.float32)
    w1b = jnp.asarray(w1, jnp.float32).astype(jnp.bfloat16).astype(jnp.float32)
    ref_matched = jnp.maximum(xb @ w1b + b1, 0.0) @ w2 + b2
    assert jnp.allclose(out, ref_matched, atol=1e-3, rtol=1e-3), (
        float(jnp.max(jnp.abs(out - ref_matched))))

    # Loose check against the full-f32 PyTorch-equivalent reference.
    ref = jnp.maximum(x @ w1 + b1, 0.0) @ w2 + b2
    assert jnp.allclose(out, ref, atol=5e-2, rtol=5e-2), (
        float(jnp.max(jnp.abs(out - ref))))

    print("KERNEL_OK")
</pallas_src>

<mosaic_0001>
module attributes {stable_mosaic.version = 11 : i64} {
  func.func @_ltr_kernel(%arg0: i32, %arg1: memref<1024x32xf32, #tpu.memory_space<vmem>>, %arg2: memref<32x128xbf16, #tpu.memory_space<vmem>>, %arg3: memref<1x128xf32, #tpu.memory_space<vmem>>, %arg4: memref<1x128xf32, #tpu.memory_space<vmem>>, %arg5: memref<1x1xf32, #tpu.memory_space<smem>>, %arg6: memref<8x128xf32, #tpu.memory_space<vmem>>) attributes {dimension_semantics = [#tpu.dimension_semantics<parallel>], iteration_bounds = array<i64: 1>, scalar_prefetch = 0 : i64, scratch_operands = 0 : i64, tpu.core_type = #tpu.core_type<tc>, window_params = [{transform_indices = @transform_0, window_bounds = array<i64: 1024, 32>}, {pipeline_mode = #tpu.pipeline_mode<synchronous>, transform_indices = @transform_1, window_bounds = array<i64: 32, 128>}, {pipeline_mode = #tpu.pipeline_mode<synchronous>, transform_indices = @transform_2, window_bounds = array<i64: 1, 128>}, {pipeline_mode = #tpu.pipeline_mode<synchronous>, transform_indices = @transform_3, window_bounds = array<i64: 1, 128>}, {transform_indices = @transform_4, window_bounds = array<i64: 1, 1>}, {transform_indices = @transform_5, window_bounds = array<i64: 8, 128>}]} {
    %c0 = arith.constant 0 : index
    %c0_0 = arith.constant 0 : index
    %0 = vector.load %arg1[%c0, %c0_0] : memref<1024x32xf32, #tpu.memory_space<vmem>>, vector<1024x32xf32>
    %1 = arith.truncf %0 : vector<1024x32xf32> to vector<1024x32xbf16>
    %c0_1 = arith.constant 0 : index
    %c0_2 = arith.constant 0 : index
    %2 = vector.load %arg2[%c0_1, %c0_2] : memref<32x128xbf16, #tpu.memory_space<vmem>>, vector<32x128xbf16>
    %cst = arith.constant dense<0.000000e+00> : vector<1024x128xf32>
    %3 = tpu.matmul %1, %2, %cst {dimension_numbers = #tpu.dot_dimension_numbers<[1], [0], [0], [1], [0, 0, 1, 1], [], []>} : vector<1024x32xbf16>, vector<32x128xbf16>, vector<1024x128xf32> -> vector<1024x128xf32>
    %c0_3 = arith.constant 0 : index
    %c0_4 = arith.constant 0 : index
    %4 = vector.load %arg3[%c0_3, %c0_4] : memref<1x128xf32, #tpu.memory_space<vmem>>, vector<1x128xf32>
    %5 = vector.broadcast %4 : vector<1x128xf32> to vector<1024x128xf32>
    %6 = arith.addf %3, %5 : vector<1024x128xf32>
    %cst_5 = arith.constant 0.000000e+00 : f32
    %7 = vector.broadcast %cst_5 : f32 to vector<1024x128xf32>
    %8 = arith.maximumf %6, %7 : vector<1024x128xf32>
    %9 = vector.shape_cast %8 : vector<1024x128xf32> to vector<8x128x128xf32>
    %c0_6 = arith.constant 0 : index
    %c0_7 = arith.constant 0 : index
    %10 = vector.load %arg4[%c0_6, %c0_7] : memref<1x128xf32, #tpu.memory_space<vmem>>, vector<1x128xf32>
    %11 = vector.shape_cast %10 : vector<1x128xf32> to vector<1x1x128xf32>
    %12 = vector.broadcast %11 : vector<1x1x128xf32> to vector<8x128x128xf32>
    %13 = arith.mulf %9, %12 : vector<8x128x128xf32>
    %cst_8 = arith.constant dense<0.000000e+00> : vector<8x128xf32>
    %14 = vector.multi_reduction <add>, %13, %cst_8 [2] : vector<8x128x128xf32> to vector<8x128xf32>
    %c0_9 = arith.constant 0 : index
    %c0_10 = arith.constant 0 : index
    %15 = memref.load %arg5[%c0_9, %c0_10] : memref<1x1xf32, #tpu.memory_space<smem>>
    %16 = vector.broadcast %15 : f32 to vector<8x128xf32>
    %17 = arith.addf %14, %16 : vector<8x128xf32>
    %c0_11 = arith.constant 0 : index
    %c0_12 = arith.constant 0 : index
    %18 = vector.load %arg6[%c0_11, %c0_12] : memref<8x128xf32, #tpu.memory_space<vmem>>, vector<8x128xf32>
    tpu.vector_store %arg6[%c0_11, %c0_12], %17 {strides = array<i32>} : memref<8x128xf32, #tpu.memory_space<vmem>>, vector<8x128xf32>,
    return
  }
  func.func @transform_0(%arg0: i32) -> (i32, i32) {
    %c0_i32 = arith.constant 0 : i32
    %c0_i32_0 = arith.constant 0 : i32
    return %arg0, %c0_i32 : i32, i32
  }
  func.func @transform_1(%arg0: i32) -> (i32, i32) {
    %c0_i32 = arith.constant 0 : i32
    %c0_i32_0 = arith.constant 0 : i32
    %c0_i32_1 = arith.constant 0 : i32
    return %c0_i32, %c0_i32_0 : i32, i32
  }
  func.func @transform_2(%arg0: i32) -> (i32, i32) {
    %c0_i32 = arith.constant 0 : i32
    %c0_i32_0 = arith.constant 0 : i32
    %c0_i32_1 = arith.constant 0 : i32
    return %c0_i32, %c0_i32_0 : i32, i32
  }
  func.func @transform_3(%arg0: i32) -> (i32, i32) {
    %c0_i32 = arith.constant 0 : i32
    %c0_i32_0 = arith.constant 0 : i32
    %c0_i32_1 = arith.constant 0 : i32
    return %c0_i32, %c0_i32_0 : i32, i32
  }
  func.func @transform_4(%arg0: i32) -> (i32, i32) {
    %c0_i32 = arith.constant 0 : i32
    %c0_i32_0 = arith.constant 0 : i32
    %c0_i32_1 = arith.constant 0 : i32
    return %c0_i32, %c0_i32_0 : i32, i32
  }
  func.func @transform_5(%arg0: i32) -> (i32, i32) {
    %c0_i32 = arith.constant 0 : i32
    %c0_i32_0 = arith.constant 0 : i32
    return %arg0, %c0_i32 : i32, i32
  }
}

</mosaic_0001>

<bundles_post_ra>
// kernel: ltr_forward.1
= control target key start
LH: loop header
LB: loop body
LE: loop exit
PB: predicated region body
PF: predicated region fallthrough
CT: control target
= control target key end

     0   :  { %vm238_vm0 = vcmask 261120   ;;  %s4311_s0 = inlined_call_operand.vmem [shape: f32[1000,32], index: 0, kind: input, shape index: {}]   ;;  %s4312_s1 = inlined_call_operand.vmem [shape: bf16[32,128], index: 1, kind: input, shape index: {}]   ;;  %s4313_s2 = inlined_call_operand.vmem [shape: f32[1,128], index: 2, kind: input, shape index: {}]   ;;  %s4314_s3 = inlined_call_operand.vmem [shape: f32[1,128], index: 3, kind: input, shape index: {}]   ;;  %s4315_s4 = inlined_call_operand.<no memory space> [shape: f32[1,1], index: 4, kind: input, shape index: {}]   ;;  %s4316_s5 = inlined_call_operand.hbm [shape: f32[8,128], index: 5, kind: output, shape index: {}]  }
   0x1   :  { %v2718_v0 = vld [vmem:[%s4312_s1] sm:$0xff]   ;;  %v2719_v1 = vld [vmem:[%s4312_s1 + $0x8] sm:$0xff]   ;;  %v25_v7 = vld [vmem:[%s4311_s0 + $0x10] sm:$0xff] }
   0x2   :  { %2581 = vmatprep.subr.bf16.mxu0 %v2718_v0  ;;  %2713 = vmatprep.subr.bf16.mxu1 %v2718_v0  ;;  %v23_v2 = vld [vmem:[%s4311_s0] sm:$0xff]  ;;  %v24_v3 = vld [vmem:[%s4311_s0 + $0x8] sm:$0xff]  ;;  %v26_v8 = vld [vmem:[%s4311_s0 + $0x18] sm:$0xff] }
   0x3   :  { %v87_v4 = vld [vmem:[%s4311_s0 + $0x200] sm:$0xff]  ;;  %2582 = vmatpush3.bf16.msra.mxu0 %v2718_v0  ;;  %2715 = vmatpush3.bf16.msra.mxu1 %v2718_v0  ;;  %v151_v5 = vpack.c.bf16 %v24_v3, %v23_v2  ;;  %v88_v6 = vld [vmem:[%s4311_s0 + $0x208] sm:$0xff]  ;;  %v89_v10 = vld [vmem:[%s4311_s0 + $0x210] sm:$0xff]  ;;  %v152_v14 = vpack.c.bf16 %v26_v8, %v25_v7 }
   0x4   :  { %2583 = vmatprep.subr.bf16.mxu0 %v2719_v1  ;;  %2714 = vmatprep.subr.bf16.mxu1 %v2719_v1  ;;  %v183_v9 = vpack.c.bf16 %v88_v6, %v87_v4  ;;  %v90_v11 = vld [vmem:[%s4311_s0 + $0x218] sm:$0xff]  ;;  %v27_v12 = vld [vmem:[%s4311_s0 + $0x20] sm:$0xff]  ;;  %v28_v13 = vld [vmem:[%s4311_s0 + $0x28] sm:$0xff] }
   0x5   :  { %2585 = vmatprep.mubr.msk.bf16.mxu0 %vm238_vm0, %v151_v5  ;;  %v184_v15 = vpack.c.bf16 %v90_v11, %v89_v10  ;;  %v91_v16 = vld [vmem:[%s4311_s0 + $0x220] sm:$0xff]  ;;  %v92_v17 = vld [vmem:[%s4311_s0 + $0x228] sm:$0xff]  ;;  %v153_v18 = vpack.c.bf16 %v28_v13, %v27_v12  ;;  %v29_v20 = vld [vmem:[%s4311_s0 + $0x30] sm:$0xff] }
   0x6   :  { %2649 = vmatprep.mubr.msk.bf16.mxu1 %vm238_vm0, %v183_v9  ;;  %v185_v19 = vpack.c.bf16 %v92_v17, %v91_v16  ;;  %v30_v21 = vld [vmem:[%s4311_s0 + $0x38] sm:$0xff]  ;;  %v93_v22 = vld [vmem:[%s4311_s0 + $0x230] sm:$0xff]  ;;  %v31_v24 = vld [vmem:[%s4311_s0 + $0x40] sm:$0xff] }
   0x7   :  { %2584 = vmatpush3.bf16.msra.mxu0 %v2719_v1  ;;  %2716 = vmatpush3.bf16.msra.mxu1 %v2719_v1  ;;  %v94_v23 = vld [vmem:[%s4311_s0 + $0x238] sm:$0xff]  ;;  %v32_v25 = vld [vmem:[%s4311_s0 + $0x48] sm:$0xff]  ;;  %v95_v26 = vld [vmem:[%s4311_s0 + $0x240] sm:$0xff]  ;;  %v154_v28 = vpack.c.bf16 %v30_v21, %v29_v20 }
   0x8   :  { %v96_v27 = vld [vmem:[%s4311_s0 + $0x248] sm:$0xff]  ;;  %v186_v29 = vpack.c.bf16 %v94_v23, %v93_v22  ;;  %v155_v30 = vpack.c.bf16 %v32_v25, %v31_v24  ;;  %v33_v32 = vld [vmem:[%s4311_s0 + $0x50] sm:$0xff]  ;;  %v34_v33 = vld [vmem:[%s4311_s0 + $0x58] sm:$0xff] }
   0x9   :  { %v187_v31 = vpack.c.bf16 %v96_v27, %v95_v26  ;;  %v97_v34 = vld [vmem:[%s4311_s0 + $0x250] sm:$0xff]  ;;  %v98_v35 = vld [vmem:[%s4311_s0 + $0x258] sm:$0xff]  ;;  %v35_v36 = vld [vmem:[%s4311_s0 + $0x60] sm:$0xff]  ;;  %v156_v40 = vpack.c.bf16 %v34_v33, %v33_v32 }
   0xa   :  { %2586 = vmatmul.mubr.msk.bf16.vlgmr.msra.gmra.mrb[0].mxu0 %vm238_vm0, %v152_v14  ;;  %2650 = vmatmul.mubr.msk.bf16.vlgmr.msra.gmra.mrb[0].mxu1 %vm238_vm0, %v184_v15  ;;  %v36_v37 = vld [vmem:[%s4311_s0 + $0x68] sm:$0xff]  ;;  %v99_v38 = vld [vmem:[%s4311_s0 + $0x260] sm:$0xff]  ;;  %v188_v41 = vpack.c.bf16 %v98_v35, %v97_v34  ;;  %v37_v44 = vld [vmem:[%s4311_s0 + $0x70] sm:$0xff] }
   0xb   :  { %2589 = vmatprep.mubr.msk.bf16.mxu0 %vm238_vm0, %v153_v18  ;;  %2653 = vmatprep.mubr.msk.bf16.mxu1 %vm238_vm0, %v185_v19  ;;  %v100_v39 = vld [vmem:[%s4311_s0 + $0x268] sm:$0xff]  ;;  %v157_v42 = vpack.c.bf16 %v36_v37, %v35_v36  ;;  %v38_v45 = vld [vmem:[%s4311_s0 + $0x78] sm:$0xff]  ;;  %v101_v46 = vld [vmem:[%s4311_s0 + $0x270] sm:$0xff] }
   0xc   :  { %v189_v43 = vpack.c.bf16 %v100_v39, %v99_v38  ;;  %v102_v47 = vld [vmem:[%s4311_s0 + $0x278] sm:$0xff]  ;;  %v39_v48 = vld [vmem:[%s4311_s0 + $0x80] sm:$0xff]  ;;  %v40_v49 = vld [vmem:[%s4311_s0 + $0x88] sm:$0xff]  ;;  %v158_v52 = vpack.c.bf16 %v38_v45, %v37_v44 }
   0xd   :  { %v103_v50 = vld [vmem:[%s4311_s0 + $0x280] sm:$0xff]  ;;  %v104_v51 = vld [vmem:[%s4311_s0 + $0x288] sm:$0xff]  ;;  %v190_v53 = vpack.c.bf16 %v102_v47, %v101_v46  ;;  %v159_v54 = vpack.c.bf16 %v40_v49, %v39_v48  ;;  %v41_v56 = vld [vmem:[%s4311_s0 + $0x90] sm:$0xff] }
   0xe   :  { %v191_v55 = vpack.c.bf16 %v104_v51, %v103_v50  ;;  %v42_v57 = vld [vmem:[%s4311_s0 + $0x98] sm:$0xff]  ;;  %v105_v58 = vld [vmem:[%s4311_s0 + $0x290] sm:$0xff]  ;;  %v43_v60 = vld [vmem:[%s4311_s0 + $0xa0] sm:$0xff] }
   0xf   :  { %v106_v59 = vld [vmem:[%s4311_s0 + $0x298] sm:$0xff]  ;;  %v44_v61 = vld [vmem:[%s4311_s0 + $0xa8] sm:$0xff]  ;;  %v107_v62 = vld [vmem:[%s4311_s0 + $0x2a0] sm:$0xff]  ;;  %v160_v0 = vpack.c.bf16 %v42_v57, %v41_v56 }
  0x10   :  { %v108_v63 = vld [vmem:[%s4311_s0 + $0x2a8] sm:$0xff]  ;;  %v192_v1 = vpack.c.bf16 %v106_v59, %v105_v58  ;;  %v161_v2 = vpack.c.bf16 %v44_v61, %v43_v60 }
  0x11   :  { %v193_v3 = vpack.c.bf16 %v108_v63, %v107_v62 }
  0x12   :  { %2590 = vmatmul.mubr.msk.bf16.gmra.mrb[4].mxu0 %vm238_vm0, %v154_v28  ;;  %2654 = vmatmul.mubr.msk.bf16.gmra.mrb[4].mxu1 %vm238_vm0, %v186_v29 }
  0x13   :  { %2593 = vmatprep.mubr.msk.bf16.mxu0 %vm238_vm0, %v155_v30  ;;  %2657 = vmatprep.mubr.msk.bf16.mxu1 %vm238_vm0, %v187_v31 }
  0x1a   :  { %2594 = vmatmul.mubr.msk.bf16.gmra.mrb[8].mxu0 %vm238_vm0, %v156_v40  ;;  %2658 = vmatmul.mubr.msk.bf16.gmra.mrb[8].mxu1 %vm238_vm0, %v188_v41 }
  0x1b   :  { %2597 = vmatprep.mubr.msk.bf16.mxu0 %vm238_vm0, %v157_v42  ;;  %2661 = vmatprep.mubr.msk.bf16.mxu1 %vm238_vm0, %v189_v43 }
  0x22   :  { %2598 = vmatmul.mubr.msk.bf16.gmra.mrb[12].mxu0 %vm238_vm0, %v158_v52  ;;  %2662 = vmatmul.mubr.msk.bf16.gmra.mrb[12].mxu1 %vm238_vm0, %v190_v53 }
  0x23   :  { %2601 = vmatprep.mubr.msk.bf16.mxu0 %vm238_vm0, %v159_v54  ;;  %2665 = vmatprep.mubr.msk.bf16.mxu1 %vm238_vm0, %v191_v55 }
  0x24   :  { %11 = vsyncpa [#allocation4], 0  ;;  %v45_v4 = vld [vmem:[%s4311_s0 + $0xb0] sm:$0xff]  ;;  %v46_v5 = vld [vmem:[%s4311_s0 + $0xb8] sm:$0xff]  ;;  %vm1764_vm1 = vcmask 130112   ;;  %vm1771_vm2 = vcmask 195712  }
  0x25   :  { %v109_v6 = vld [vmem:[%s4311_s0 + $0x2b0] sm:$0xff]  ;;  %v110_v7 = vld [vmem:[%s4311_s0 + $0x2b8] sm:$0xff]  ;;  %v47_v8 = vld [vmem:[%s4311_s0 + $0xc0] sm:$0xff]  ;;  %v162_v12 = vpack.c.bf16 %v46_v5, %v45_v4  ;;  %vm1778_vm3 = vcmask 261312   ;;  %vm1785_vm4 = vcmask 326912   ;;  %vm1792_vm5 = vcmask 392512  }
  0x26   :  { %v48_v9 = vld [vmem:[%s4311_s0 + $0xc8] sm:$0xff]  ;;  %v111_v10 = vld [vmem:[%s4311_s0 + $0x2c0] sm:$0xff]  ;;  %v194_v13 = vpack.c.bf16 %v110_v7, %v109_v6  ;;  %v49_v16 = vld [vmem:[%s4311_s0 + $0xd0] sm:$0xff]  ;;  %vm1799_vm6 = vcmask 458112   ;;  %vm1806_vm7 = vcmask 523712   ;;  %vm1813_vm8 = vcmask 589312  }
  0x27   :  { %v112_v11 = vld [vmem:[%s4311_s0 + $0x2c8] sm:$0xff]  ;;  %v163_v14 = vpack.c.bf16 %v48_v9, %v47_v8  ;;  %v50_v17 = vld [vmem:[%s4311_s0 + $0xd8] sm:$0xff]  ;;  %v113_v18 = vld [vmem:[%s4311_s0 + $0x2d0] sm:$0xff]  ;;  %vm1820_vm9 = vcmask 654912   ;;  %vm1827_vm10 = vcmask 720512   ;;  %vm1834_vm11 = vcmask 786112  }
  0x28   :  { %v195_v15 = vpack.c.bf16 %v112_v11, %v111_v10  ;;  %v114_v19 = vld [vmem:[%s4311_s0 + $0x2d8] sm:$0xff]  ;;  %v51_v20 = vld [vmem:[%s4311_s0 + $0xe0] sm:$0xff]  ;;  %v52_v21 = vld [vmem:[%s4311_s0 + $0xe8] sm:$0xff]  ;;  %v164_v24 = vpack.c.bf16 %v50_v17, %v49_v16  ;;  %vm1841_vm12 = vcmask 851712   ;;  %vm1848_vm13 = vcmask 917312  }
  0x29   :  { %v115_v22 = vld [vmem:[%s4311_s0 + $0x2e0] sm:$0xff]  ;;  %v116_v23 = vld [vmem:[%s4311_s0 + $0x2e8] sm:$0xff]  ;;  %v196_v25 = vpack.c.bf16 %v114_v19, %v113_v18  ;;  %v165_v26 = vpack.c.bf16 %v52_v21, %v51_v20  ;;  %v53_v28 = vld [vmem:[%s4311_s0 + $0xf0] sm:$0xff]  ;;  %vm1855_vm14 = vcmask 982912   ;;  %vm1862_vm15 = vcmask 1048512  }
  0x2a   :  { %2602 = vmatmul.mubr.msk.bf16.gmra.mrb[16].mxu0 %vm238_vm0, %v160_v0  ;;  %2666 = vmatmul.mubr.msk.bf16.gmra.mrb[16].mxu1 %vm238_vm0, %v192_v1  ;;  %v197_v27 = vpack.c.bf16 %v116_v23, %v115_v22  ;;  %v54_v29 = vld [vmem:[%s4311_s0 + $0xf8] sm:$0xff]  ;;  %v117_v30 = vld [vmem:[%s4311_s0 + $0x2f0] sm:$0xff]  ;;  %v55_v32 = vld [vmem:[%s4311_s0 + $0x100] sm:$0xff] }
  0x2b   :  { %2605 = vmatprep.mubr.msk.bf16.mxu0 %vm238_vm0, %v161_v2  ;;  %2669 = vmatprep.mubr.msk.bf16.mxu1 %vm238_vm0, %v193_v3  ;;  %v118_v31 = vld [vmem:[%s4311_s0 + $0x2f8] sm:$0xff]  ;;  %v56_v33 = vld [vmem:[%s4311_s0 + $0x108] sm:$0xff]  ;;  %v119_v34 = vld [vmem:[%s4311_s0 + $0x300] sm:$0xff]  ;;  %v166_v36 = vpack.c.bf16 %v54_v29, %v53_v28 }
  0x2c   :  { %v120_v35 = vld [vmem:[%s4311_s0 + $0x308] sm:$0xff]  ;;  %v198_v37 = vpack.c.bf16 %v118_v31, %v117_v30  ;;  %v167_v38 = vpack.c.bf16 %v56_v33, %v55_v32  ;;  %v57_v40 = vld [vmem:[%s4311_s0 + $0x110] sm:$0xff]  ;;  %v58_v41 = vld [vmem:[%s4311_s0 + $0x118] sm:$0xff] }
  0x2d   :  { %v199_v39 = vpack.c.bf16 %v120_v35, %v119_v34  ;;  %v121_v42 = vld [vmem:[%s4311_s0 + $0x310] sm:$0xff]  ;;  %v122_v43 = vld [vmem:[%s4311_s0 + $0x318] sm:$0xff]  ;;  %v123_v44 = vld [vmem:[%s4311_s0 + $0x320] sm:$0xff]  ;;  %v168_v48 = vpack.c.bf16 %v58_v41, %v57_v40 }
  0x2e   :  { %v124_v45 = vld [vmem:[%s4311_s0 + $0x328] sm:$0xff]  ;;  %v59_v46 = vld [vmem:[%s4311_s0 + $0x120] sm:$0xff]  ;;  %v200_v49 = vpack.c.bf16 %v122_v43, %v121_v42  ;;  %v125_v52 = vld [vmem:[%s4311_s0 + $0x330] sm:$0xff] }
  0x2f   :  { %v60_v47 = vld [vmem:[%s4311_s0 + $0x128] sm:$0xff]  ;;  %v201_v50 = vpack.c.bf16 %v124_v45, %v123_v44  ;;  %v126_v53 = vld [vmem:[%s4311_s0 + $0x338] sm:$0xff]  ;;  %v61_v54 = vld [vmem:[%s4311_s0 + $0x130] sm:$0xff] }
  0x30   :  { %v169_v51 = vpack.c.bf16 %v60_v47, %v59_v46  ;;  %v62_v55 = vld [vmem:[%s4311_s0 + $0x138] sm:$0xff]  ;;  %v127_v56 = vld [vmem:[%s4311_s0 + $0x340] sm:$0xff]  ;;  %v128_v57 = vld [vmem:[%s4311_s0 + $0x348] sm:$0xff]  ;;  %v202_v60 = vpack.c.bf16 %v126_v53, %v125_v52 }
  0x31   :  { %v63_v58 = vld [vmem:[%s4311_s0 + $0x140] sm:$0xff]  ;;  %v64_v59 = vld [vmem:[%s4311_s0 + $0x148] sm:$0xff]  ;;  %v170_v61 = vpack.c.bf16 %v62_v55, %v61_v54  ;;  %v203_v62 = vpack.c.bf16 %v128_v57, %v127_v56  ;;  %v129_v0 = vld [vmem:[%s4311_s0 + $0x350] sm:$0xff] }
  0x32   :  { %2606 = vmatmul.mubr.msk.bf16.gmra.mrb[20].mxu0 %vm238_vm0, %v162_v12  ;;  %2670 = vmatmul.mubr.msk.bf16.gmra.mrb[20].mxu1 %vm238_vm0, %v194_v13  ;;  %v171_v63 = vpack.c.bf16 %v64_v59, %v63_v58  ;;  %v130_v1 = vld [vmem:[%s4311_s0 + $0x358] sm:$0xff]  ;;  %v65_v2 = vld [vmem:[%s4311_s0 + $0x150] sm:$0xff]  ;;  %v131_v4 = vld [vmem:[%s4311_s0 + $0x360] sm:$0xff] }
  0x33   :  { %2609 = vmatprep.mubr.msk.bf16.mxu0 %vm238_vm0, %v163_v14  ;;  %2673 = vmatprep.mubr.msk.bf16.mxu1 %vm238_vm0, %v195_v15  ;;  %v66_v3 = vld [vmem:[%s4311_s0 + $0x158] sm:$0xff]  ;;  %v132_v5 = vld [vmem:[%s4311_s0 + $0x368] sm:$0xff]  ;;  %v67_v6 = vld [vmem:[%s4311_s0 + $0x160] sm:$0xff]  ;;  %v204_v8 = vpack.c.bf16 %v130_v1, %v129_v0 }
  0x34   :  { %v68_v7 = vld [vmem:[%s4311_s0 + $0x168] sm:$0xff]  ;;  %v172_v9 = vpack.c.bf16 %v66_v3, %v65_v2  ;;  %v205_v10 = vpack.c.bf16 %v132_v5, %v131_v4  ;;  %v133_v12 = vld [vmem:[%s4311_s0 + $0x370] sm:$0xff]  ;;  %v134_v13 = vld [vmem:[%s4311_s0 + $0x378] sm:$0xff] }
  0x35   :  { %v173_v11 = vpack.c.bf16 %v68_v7, %v67_v6  ;;  %v69_v14 = vld [vmem:[%s4311_s0 + $0x170] sm:$0xff]  ;;  %v70_v15 = vld [vmem:[%s4311_s0 + $0x178] sm:$0xff]  ;;  %v135_v16 = vld [vmem:[%s4311_s0 + $0x380] sm:$0xff]  ;;  %v206_v20 = vpack.c.bf16 %v134_v13, %v133_v12 }
  0x36   :  { %v136_v17 = vld [vmem:[%s4311_s0 + $0x388] sm:$0xff]  ;;  %v71_v18 = vld [vmem:[%s4311_s0 + $0x180] sm:$0xff]  ;;  %v174_v21 = vpack.c.bf16 %v70_v15, %v69_v14 }
  0x37   :  { %v72_v19 = vld [vmem:[%s4311_s0 + $0x188] sm:$0xff]  ;;  %v207_v22 = vpack.c.bf16 %v136_v17, %v135_v16  ;;  %v139_v28 = vld [vmem:[%s4311_s0 + $0x3a0] sm:$0xff] }
  0x38   :  { %v175_v23 = vpack.c.bf16 %v72_v19, %v71_v18  ;;  %v140_v29 = vld [vmem:[%s4311_s0 + $0x3a8] sm:$0xff]  ;;  %v75_v30 = vld [vmem:[%s4311_s0 + $0x1a0] sm:$0xff] }
  0x39   :  { %v76_v31 = vld [vmem:[%s4311_s0 + $0x1a8] sm:$0xff]  ;;  %v209_v34 = vpack.c.bf16 %v140_v29, %v139_v28  ;;  %v143_v40 = vld [vmem:[%s4311_s0 + $0x3c0] sm:$0xff] }
  0x3a   :  { %2610 = vmatmul.mubr.msk.bf16.gmra.mrb[24].mxu0 %vm238_vm0, %v164_v24  ;;  %2674 = vmatmul.mubr.msk.bf16.gmra.mrb[24].mxu1 %vm238_vm0, %v196_v25  ;;  %v137_v24 = vld [vmem:[%s4311_s0 + $0x390] sm:$0xff]  ;;  %v138_v25 = vld [vmem:[%s4311_s0 + $0x398] sm:$0xff]  ;;  %v177_v35 = vpack.c.bf16 %v76_v31, %v75_v30  ;;  %v144_v41 = vld [vmem:[%s4311_s0 + $0x3c8] sm:$0xff] }
  0x3b   :  { %2613 = vmatprep.mubr.msk.bf16.mxu0 %vm238_vm0, %v165_v26  ;;  %2677 = vmatprep.mubr.msk.bf16.mxu1 %vm238_vm0, %v197_v27  ;;  %v73_v26 = vld [vmem:[%s4311_s0 + $0x190] sm:$0xff]  ;;  %v74_v27 = vld [vmem:[%s4311_s0 + $0x198] sm:$0xff]  ;;  %v208_v32 = vpack.c.bf16 %v138_v25, %v137_v24  ;;  %v79_v42 = vld [vmem:[%s4311_s0 + $0x1c0] sm:$0xff]  ;;  %v211_v46 = vpack.c.bf16 %v144_v41, %v143_v40 }
  0x3c   :  { %v176_v33 = vpack.c.bf16 %v74_v27, %v73_v26  ;;  %v80_v43 = vld [vmem:[%s4311_s0 + $0x1c8] sm:$0xff]  ;;  %v147_v52 = vld [vmem:[%s4311_s0 + $0x3e0] sm:$0xff] }
  0x3d   :  { %v179_v47 = vpack.c.bf16 %v80_v43, %v79_v42  ;;  %v148_v53 = vld [vmem:[%s4311_s0 + $0x3e8] sm:$0xff]  ;;  %v83_v54 = vld [vmem:[%s4311_s0 + $0x1e0] sm:$0xff] }
  0x3e   :  { %v84_v55 = vld [vmem:[%s4311_s0 + $0x1e8] sm:$0xff]  ;;  %v213_v58 = vpack.c.bf16 %v148_v53, %v147_v52  ;;  %v3234_v2 = vld [vmem:[%s4313_s2] ss:$0 sm:$0xff] }
  0x3f   :  { %v181_v59 = vpack.c.bf16 %v84_v55, %v83_v54  ;;  %v3242_v12 = vld [vmem:[%s4314_s3] ss:$0 sm:$0xff] }
  0x42   :  { %2614 = vmatmul.mubr.msk.bf16.gmra.mrb[28].mxu0 %vm238_vm0, %v166_v36  ;;  %2678 = vmatmul.mubr.msk.bf16.gmra.mrb[28].mxu1 %vm238_vm0, %v198_v37  ;;  %v141_v36 = vld [vmem:[%s4311_s0 + $0x3b0] sm:$0xff]  ;;  %v142_v37 = vld [vmem:[%s4311_s0 + $0x3b8] sm:$0xff] }
  0x43   :  { %2617 = vmatprep.mubr.msk.bf16.mxu0 %vm238_vm0, %v167_v38  ;;  %2681 = vmatprep.mubr.msk.bf16.mxu1 %vm238_vm0, %v199_v39  ;;  %v77_v38 = vld [vmem:[%s4311_s0 + $0x1b0] sm:$0xff]  ;;  %v78_v39 = vld [vmem:[%s4311_s0 + $0x1b8] sm:$0xff]  ;;  %v210_v44 = vpack.c.bf16 %v142_v37, %v141_v36 }
  0x44   :  { %v178_v45 = vpack.c.bf16 %v78_v39, %v77_v38 }
  0x4a   :  { %2618 = vmatmul.mubr.msk.bf16.gmra.mrb[32].mxu0 %vm238_vm0, %v168_v48  ;;  %2682 = vmatmul.mubr.msk.bf16.gmra.mrb[32].mxu1 %vm238_vm0, %v200_v49  ;;  %v145_v48 = vld [vmem:[%s4311_s0 + $0x3d0] sm:$0xff]  ;;  %v146_v49 = vld [vmem:[%s4311_s0 + $0x3d8] sm:$0xff] }
  0x4b   :  { %2685 = vmatprep.mubr.msk.bf16.mxu1 %vm238_vm0, %v201_v50  ;;  %2621 = vmatprep.mubr.msk.bf16.mxu0 %vm238_vm0, %v169_v51  ;;  %v81_v50 = vld [vmem:[%s4311_s0 + $0x1d0] sm:$0xff]  ;;  %v82_v51 = vld [vmem:[%s4311_s0 + $0x1d8] sm:$0xff]  ;;  %v212_v56 = vpack.c.bf16 %v146_v49, %v145_v48 }
  0x4c   :  { %v180_v57 = vpack.c.bf16 %v82_v51, %v81_v50 }
  0x52   :  { %2686 = vmatmul.mubr.msk.bf16.gmra.mrb[36].mxu1 %vm238_vm0, %v202_v60  ;;  %2622 = vmatmul.mubr.msk.bf16.gmra.mrb[36].mxu0 %vm238_vm0, %v170_v61  ;;  %v149_v60 = vld [vmem:[%s4311_s0 + $0x3f0] sm:$0xff]  ;;  %v150_v61 = vld [vmem:[%s4311_s0 + $0x3f8] sm:$0xff] }
  0x53   :  { %2689 = vmatprep.mubr.msk.bf16.mxu1 %vm238_vm0, %v203_v62  ;;  %2625 = vmatprep.mubr.msk.bf16.mxu0 %vm238_vm0, %v171_v63  ;;  %v85_v62 = vld [vmem:[%s4311_s0 + $0x1f0] sm:$0xff]  ;;  %v86_v63 = vld [vmem:[%s4311_s0 + $0x1f8] sm:$0xff]  ;;  %v214_v0 = vpack.c.bf16 %v150_v61, %v149_v60 }
  0x54   :  { %v182_v1 = vpack.c.bf16 %v86_v63, %v85_v62 }
  0x5a   :  { %2690 = vmatmul.mubr.msk.bf16.gmra.mrb[40].mxu1 %vm238_vm0, %v204_v8  ;;  %2626 = vmatmul.mubr.msk.bf16.gmra.mrb[40].mxu0 %vm238_vm0, %v172_v9 }
  0x5b   :  { %2693 = vmatprep.mubr.msk.bf16.mxu1 %vm238_vm0, %v205_v10  ;;  %2629 = vmatprep.mubr.msk.bf16.mxu0 %vm238_vm0, %v173_v11 }
  0x62   :  { %2694 = vmatmul.mubr.msk.bf16.gmra.mrb[44].mxu1 %vm238_vm0, %v206_v20  ;;  %2630 = vmatmul.mubr.msk.bf16.gmra.mrb[44].mxu0 %vm238_vm0, %v174_v21 }
  0x63   :  { %2697 = vmatprep.mubr.msk.bf16.mxu1 %vm238_vm0, %v207_v22  ;;  %2633 = vmatprep.mubr.msk.bf16.mxu0 %vm238_vm0, %v175_v23 }
  0x6a   :  { %2698 = vmatmul.mubr.msk.bf16.gmra.mrb[48].mxu1 %vm238_vm0, %v208_v32  ;;  %2634 = vmatmul.mubr.msk.bf16.gmra.mrb[48].mxu0 %vm238_vm0, %v176_v33 }
  0x6b   :  { %2701 = vmatprep.mubr.msk.bf16.mxu1 %vm238_vm0, %v209_v34  ;;  %2637 = vmatprep.mubr.msk.bf16.mxu0 %vm238_vm0, %v177_v35 }
  0x72   :  { %2702 = vmatmul.mubr.msk.bf16.gmra.mrb[52].mxu1 %vm238_vm0, %v210_v44  ;;  %2638 = vmatmul.mubr.msk.bf16.gmra.mrb[52].mxu0 %vm238_vm0, %v178_v45 }
  0x73   :  { %2705 = vmatprep.mubr.msk.bf16.mxu1 %vm238_vm0, %v211_v46  ;;  %2641 = vmatprep.mubr.msk.bf16.mxu0 %vm238_vm0, %v179_v47 }
  0x7a   :  { %2706 = vmatmul.mubr.msk.bf16.gmra.mrb[56].mxu1 %vm238_vm0, %v212_v56  ;;  %2642 = vmatmul.mubr.msk.bf16.gmra.mrb[56].mxu0 %vm238_vm0, %v180_v57 }
  0x7b   :  { %2709 = vmatprep.mubr.msk.bf16.mxu1 %vm238_vm0, %v213_v58  ;;  %2645 = vmatprep.mubr.msk.bf16.mxu0 %vm238_vm0, %v181_v59 }
  0x82   :  { %2710 = vmatmul.mubr.msk.bf16.gmra.mrb[60].mxu1 %vm238_vm0, %v214_v0  ;;  %2646 = vmatmul.mubr.msk.bf16.gmra.mrb[60].mxu0 %vm238_vm0, %v182_v1  ;;  %vm2417_vm0 = vcmask 1041409  }
  0xdd   :  { %v2587_v3 = vpop.f32.mrb[0].mxu0  ;;  %v2651_v4 = vpop.f32.mrb[0].mxu1 }
  0xde   :  { %v474_v5 = vadd.f32 %v2587_v3, %v3234_v2  ;;  %v730_v6 = vadd.f32 %v2651_v4, %v3234_v2  ;;  %v465_v7 = vpop.f32.mrb[1].mxu0  ;;  %v721_v8 = vpop.f32.mrb[1].mxu1 }
  0xdf   :  { %v466_v9 = vadd.f32 %v3234_v2, %v465_v7  ;;  %v2588_v10 = vpop.f32.mrb[2].mxu0  ;;  %v2652_v11 = vpop.f32.mrb[2].mxu1  ;;  %v722_v18 = vadd.f32 %v3234_v2, %v721_v8 }
  0xe0   :  { %v978_v13 = vmax.f32 %v474_v5, 0.0  ;;  %v1042_v14 = vmax.f32 %v730_v6, 0.0  ;;  %v477_v15 = vadd.f32 %v2588_v10, %v3234_v2  ;;  %v468_v16 = vpop.f32.mrb[3].mxu0  ;;  %v724_v17 = vpop.f32.mrb[3].mxu1  ;;  %v733_v19 = vadd.f32 %v2652_v11, %v3234_v2 }
  0xe1   :  { %v976_v20 = vmax.f32 %v466_v9, 0.0  ;;  %v1040_v24 = vmax.f32 %v722_v18, 0.0  ;;  %v469_v25 = vadd.f32 %v3234_v2, %v468_v16  ;;  %v725_v29 = vadd.f32 %v3234_v2, %v724_v17 }
  0xe2   :  { %v979_v21 = vmax.f32 %v477_v15, 0.0  ;;  %v1177_v22 = vmul.f32 %v3242_v12, %v1042_v14  ;;  %v1113_v23 = vmul.f32 %v3242_v12, %v978_v13  ;;  %v1043_v28 = vmax.f32 %v733_v19, 0.0 }
  0xe3   :  { %v1111_v31 = vmul.f32 %v3242_v12, %v976_v20  ;;  %v977_v40 = vmax.f32 %v469_v25, 0.0  ;;  %v1041_v41 = vmax.f32 %v725_v29, 0.0  ;;  %v1175_v43 = vmul.f32 %v3242_v12, %v1040_v24 }
  0xe4   :  { %1371 = vadd.xlane.f32.xlu0 %v1177_v22  ;;  %1243 = vadd.xlane.f32.xlu1 %v1113_v23  ;;  %v1114_v30 = vmul.f32 %v3242_v12, %v979_v21  ;;  %v1178_v42 = vmul.f32 %v3242_v12, %v1043_v28 }
  0xe5   :  { %v2591_v26 = vpop.f32.mrb[4].mxu0  ;;  %v2655_v27 = vpop.f32.mrb[4].mxu1  ;;  %v1176_v50 = vmul.f32 %v3242_v12, %v1041_v41  ;;  %v1112_v51 = vmul.f32 %v3242_v12, %v977_v40 }
  0xe6   :  { %v481_v32 = vpop.f32.mrb[5].mxu0  ;;  %v737_v33 = vpop.f32.mrb[5].mxu1  ;;  %v490_v36 = vadd.f32 %v2591_v26, %v3234_v2  ;;  %v746_v46 = vadd.f32 %v2655_v27, %v3234_v2 }
  0xe7   :  { %v2592_v34 = vpop.f32.mrb[6].mxu0  ;;  %v2656_v35 = vpop.f32.mrb[6].mxu1  ;;  %v482_v62 = vadd.f32 %v3234_v2, %v481_v32  ;;  %v738_v7 = vadd.f32 %v3234_v2, %v737_v33 }
  0xe8   :  { %1245 = vadd.xlane.f32.xlu1 %v1114_v30  ;;  %1239 = vadd.xlane.f32.xlu0 %v1111_v31  ;;  %v493_v37 = vadd.f32 %v2592_v34, %v3234_v2  ;;  %v484_v38 = vpop.f32.mrb[7].mxu0  ;;  %v740_v39 = vpop.f32.mrb[7].mxu1  ;;  %v982_v44 = vmax.f32 %v490_v36, 0.0  ;;  %v749_v47 = vadd.f32 %v2656_v35, %v3234_v2  ;;  %v1046_v56 = vmax.f32 %v746_v46, 0.0 }
  0xe9   :  { %v485_v63 = vadd.f32 %v3234_v2, %v484_v38  ;;  %v980_v5 = vmax.f32 %v482_v62, 0.0  ;;  %v741_v8 = vadd.f32 %v3234_v2, %v740_v39  ;;  %v1044_v18 = vmax.f32 %v738_v7, 0.0 }
  0xea   :  { %v983_v45 = vmax.f32 %v493_v37, 0.0  ;;  %v1047_v57 = vmax.f32 %v749_v47, 0.0  ;;  %v1117_v59 = vmul.f32 %v3242_v12, %v982_v44  ;;  %v1181_v1 = vmul.f32 %v3242_v12, %v1046_v56 }
  0xeb   :  { %v981_v6 = vmax.f32 %v485_v63, 0.0  ;;  %v1045_v19 = vmax.f32 %v741_v8, 0.0  ;;  %v1115_v21 = vmul.f32 %v3242_v12, %v980_v5  ;;  %v1179_v29 = vmul.f32 %v3242_v12, %v1044_v18 }
  0xec   :  { %1373 = vadd.xlane.f32.xlu1 %v1178_v42  ;;  %1367 = vadd.xlane.f32.xlu0 %v1175_v43  ;;  %v1118_v58 = vmul.f32 %v3242_v12, %v983_v45  ;;  %v1182_v0 = vmul.f32 %v3242_v12, %v1047_v57 }
  0xed   :  { %v2595_v48 = vpop.f32.mrb[8].mxu0  ;;  %v2659_v49 = vpop.f32.mrb[8].mxu1  ;;  %v1116_v20 = vmul.f32 %v3242_v12, %v981_v6  ;;  %v1180_v28 = vmul.f32 %v3242_v12, %v1045_v19 }
  0xee   :  { %v497_v52 = vpop.f32.mrb[9].mxu0  ;;  %v3261_v53 = vpop.f32.mrb[9].mxu1  ;;  %v506_v14 = vadd.f32 %v2595_v48, %v3234_v2  ;;  %v762_v24 = vadd.f32 %v2659_v49, %v3234_v2 }
  0xef   :  { %v2596_v54 = vpop.f32.mrb[10].mxu0  ;;  %v2660_v55 = vpop.f32.mrb[10].mxu1  ;;  %v498_v40 = vadd.f32 %v3234_v2, %v497_v52  ;;  %v754_v48 = vadd.f32 %v3234_v2, %v3261_v53 }
  0xf0   :  { %1369 = vadd.xlane.f32.xlu1 %v1176_v50  ;;  %1241 = vadd.xlane.f32.xlu0 %v1112_v51  ;;  %v500_v60 = vpop.f32.mrb[11].mxu0  ;;  %v756_v61 = vpop.f32.mrb[11].mxu1  ;;  %v509_v15 = vadd.f32 %v2596_v54, %v3234_v2  ;;  %v986_v22 = vmax.f32 %v506_v14, 0.0  ;;  %v765_v25 = vadd.f32 %v2660_v55, %v3234_v2  ;;  %v1050_v34 = vmax.f32 %v762_v24, 0.0 }
  0xf1   :  { %v501_v41 = vadd.f32 %v3234_v2, %v500_v60  ;;  %v984_v46 = vmax.f32 %v498_v40, 0.0  ;;  %v757_v49 = vadd.f32 %v3234_v2, %v756_v61  ;;  %v1048_v53 = vmax.f32 %v754_v48, 0.0 }
  0xf2   :  { %v987_v23 = vmax.f32 %v509_v15, 0.0  ;;  %v1051_v35 = vmax.f32 %v765_v25, 0.0  ;;  %v1121_v37 = vmul.f32 %v3242_v12, %v986_v22  ;;  %v1185_v43 = vmul.f32 %v3242_v12, %v1050_v34 }
  0xf3   :  { %v985_v47 = vmax.f32 %v501_v41, 0.0  ;;  %v1119_v61 = vmul.f32 %v3242_v12, %v984_v46  ;;  %v1183_v7 = vmul.f32 %v3242_v12, %v1048_v53 }
  0xf4   :  { %1253 = vadd.xlane.f32.xlu1 %v1118_v58  ;;  %1251 = vadd.xlane.f32.xlu0 %v1117_v59  ;;  %v1122_v36 = vmul.f32 %v3242_v12, %v987_v23  ;;  %v1186_v42 = vmul.f32 %v3242_v12, %v1051_v35  ;;  %v1049_v59 = vmax.f32 %v757_v49, 0.0 }
  0xf5   :  { %v2599_v3 = vpop.f32.mrb[12].mxu0  ;;  %v3269_v4 = vpop.f32.mrb[12].mxu1  ;;  %v1120_v60 = vmul.f32 %v3242_v12, %v985_v47 }
  0xf6   :  { %v3273_v9 = vpop.f32.mrb[13].mxu0  ;;  %v3275_v10 = vpop.f32.mrb[13].mxu1  ;;  %v522_v55 = vadd.f32 %v2599_v3, %v3234_v2  ;;  %v1184_v6 = vmul.f32 %v3242_v12, %v1049_v59 }
  0xf7   :  { %v2600_v11 = vpop.f32.mrb[14].mxu0  ;;  %v3277_v13 = vpop.f32.mrb[14].mxu1  ;;  %v514_v22 = vadd.f32 %v3234_v2, %v3273_v9 }
  0xf8   :  { %1381 = vadd.xlane.f32.xlu1 %v1182_v0  ;;  %1379 = vadd.xlane.f32.xlu0 %v1181_v1  ;;  %v3281_v16 = vpop.f32.mrb[15].mxu0  ;;  %v3283_v17 = vpop.f32.mrb[15].mxu1  ;;  %v525_v56 = vadd.f32 %v2600_v11, %v3234_v2  ;;  %v990_v62 = vmax.f32 %v522_v55, 0.0  ;;  %v778_v0 = vadd.f32 %v3269_v4, %v3234_v2  ;;  %v781_v1 = vadd.f32 %v3277_v13, %v3234_v2 }
  0xf9   :  { %v517_v23 = vadd.f32 %v3234_v2, %v3281_v16  ;;  %v988_v34 = vmax.f32 %v514_v22, 0.0  ;;  %v773_v9 = vadd.f32 %v3234_v2, %v3283_v17 }
  0xfa   :  { %v991_v63 = vmax.f32 %v525_v56, 0.0  ;;  %v1054_v4 = vmax.f32 %v778_v0, 0.0  ;;  %v1055_v18 = vmax.f32 %v781_v1, 0.0  ;;  %v1125_v19 = vmul.f32 %v3242_v12, %v990_v62 }
  0xfb   :  { %v989_v35 = vmax.f32 %v517_v23, 0.0  ;;  %v1053_v47 = vmax.f32 %v773_v9, 0.0  ;;  %v1123_v49 = vmul.f32 %v3242_v12, %v988_v34 }
  0xfc   :  { %1249 = vadd.xlane.f32.xlu1 %v1116_v20  ;;  %1247 = vadd.xlane.f32.xlu0 %v1115_v21  ;;  %v1126_v13 = vmul.f32 %v3242_v12, %v991_v63  ;;  %v1190_v24 = vmul.f32 %v3242_v12, %v1055_v18  ;;  %v1189_v25 = vmul.f32 %v3242_v12, %v1054_v4 }
  0xfd   :  { %v3289_v26 = vpop.f32.mrb[16].mxu0  ;;  %v3291_v27 = vpop.f32.mrb[16].mxu1  ;;  %v1124_v48 = vmul.f32 %v3242_v12, %v989_v35 }
  0xfe   :  { %v3295_v30 = vpop.f32.mrb[17].mxu0  ;;  %v3297_v31 = vpop.f32.mrb[17].mxu1 }
  0xff   :  { %v3299_v32 = vpop.f32.mrb[18].mxu0  ;;  %v3301_v33 = vpop.f32.mrb[18].mxu1 }
 0x100   :  { %1377 = vadd.xlane.f32.xlu1 %v1180_v28  ;;  %1375 = vadd.xlane.f32.xlu0 %v1179_v29  ;;  %v3305_v38 = vpop.f32.mrb[19].mxu0  ;;  %v3307_v39 = vpop.f32.mrb[19].mxu1 }
 0x104   :  { %1261 = vadd.xlane.f32.xlu1 %v1122_v36  ;;  %1259 = vadd.xlane.f32.xlu0 %v1121_v37  ;;  %v770_v36 = vadd.f32 %v3234_v2, %v3275_v10 }
 0x105   :  { %v3313_v44 = vpop.f32.mrb[20].mxu0  ;;  %v3315_v45 = vpop.f32.mrb[20].mxu1 }
 0x106   :  { %v3320_v50 = vpop.f32.mrb[21].mxu0  ;;  %v3322_v51 = vpop.f32.mrb[21].mxu1  ;;  %v1052_v17 = vmax.f32 %v770_v36, 0.0  ;;  %v786_v36 = vadd.f32 %v3234_v2, %v3297_v31 }
 0x107   :  { %v3324_v52 = vpop.f32.mrb[22].mxu0  ;;  %v3326_v54 = vpop.f32.mrb[22].mxu1 }
 0x108   :  { %1389 = vadd.xlane.f32.xlu1 %v1186_v42  ;;  %1387 = vadd.xlane.f32.xlu0 %v1185_v43  ;;  %v3330_v57 = vpop.f32.mrb[23].mxu0  ;;  %v3332_v58 = vpop.f32.mrb[23].mxu1  ;;  %v538_v42 = vadd.f32 %v3289_v26, %v3234_v2  ;;  %v541_v43 = vadd.f32 %v3299_v32, %v3234_v2  ;;  %v794_v26 = vadd.f32 %v3291_v27, %v3234_v2 }
 0x109   :  { %v797_v32 = vadd.f32 %v3301_v33, %v3234_v2 }
 0x10a   :  { %v994_v55 = vmax.f32 %v538_v42, 0.0  ;;  %v995_v56 = vmax.f32 %v541_v43, 0.0  ;;  %v1058_v27 = vmax.f32 %v794_v26, 0.0 }
 0x10c   :  { %1257 = vadd.xlane.f32.xlu1 %v1120_v60  ;;  %1255 = vadd.xlane.f32.xlu0 %v1119_v61  ;;  %v1188_v60 = vmul.f32 %v3242_v12, %v1053_v47  ;;  %v1187_v61 = vmul.f32 %v3242_v12, %v1052_v17  ;;  %v1130_v33 = vmul.f32 %v3242_v12, %v995_v56 }
 0x10d   :  { %v3340_v3 = vpop.f32.mrb[24].mxu0  ;;  %v3342_v5 = vpop.f32.mrb[24].mxu1  ;;  %v1193_v23 = vmul.f32 %v3242_v12, %v1058_v27  ;;  %v554_v17 = vadd.f32 %v3313_v44, %v3234_v2  ;;  %v810_v47 = vadd.f32 %v3315_v45, %v3234_v2  ;;  %v546_v45 = vadd.f32 %v3234_v2, %v3320_v50 }
 0x10e   :  { %v3346_v8 = vpop.f32.mrb[25].mxu0  ;;  %v3348_v11 = vpop.f32.mrb[25].mxu1 }
 0x10f   :  { %v3350_v14 = vpop.f32.mrb[26].mxu0  ;;  %v3352_v15 = vpop.f32.mrb[26].mxu1  ;;  %v998_v26 = vmax.f32 %v554_v17, 0.0  ;;  %v549_v17 = vadd.f32 %v3234_v2, %v3330_v57 }
 0x110   :  { %1385 = vadd.xlane.f32.xlu1 %v1184_v6  ;;  %1383 = vadd.xlane.f32.xlu0 %v1183_v7  ;;  %v3356_v20 = vpop.f32.mrb[27].mxu0  ;;  %v3358_v21 = vpop.f32.mrb[27].mxu1  ;;  %v1059_v6 = vmax.f32 %v797_v32, 0.0  ;;  %v1129_v7 = vmul.f32 %v3242_v12, %v994_v55  ;;  %v1062_v32 = vmax.f32 %v810_v47, 0.0  ;;  %v805_v47 = vadd.f32 %v3234_v2, %v3332_v58 }
 0x111   :  { %v1133_v50 = vmul.f32 %v3242_v12, %v998_v26  ;;  %v570_v58 = vadd.f32 %v3340_v3, %v3234_v2 }
 0x112   :  { %v1194_v22 = vmul.f32 %v3242_v12, %v1059_v6 }
 0x114   :  { %1269 = vadd.xlane.f32.xlu1 %v1126_v13  ;;  %1267 = vadd.xlane.f32.xlu0 %v1125_v19  ;;  %v530_v13 = vadd.f32 %v3234_v2, %v3295_v30  ;;  %v533_v19 = vadd.f32 %v3234_v2, %v3305_v38  ;;  %v789_v30 = vadd.f32 %v3234_v2, %v3307_v39  ;;  %v1056_v39 = vmax.f32 %v786_v36, 0.0 }
 0x115   :  { %v3366_v28 = vpop.f32.mrb[28].mxu0  ;;  %v3368_v29 = vpop.f32.mrb[28].mxu1 }
 0x116   :  { %v3374_v37 = vpop.f32.mrb[29].mxu0  ;;  %v3376_v16 = vpop.f32.mrb[29].mxu1  ;;  %v992_v34 = vmax.f32 %v530_v13, 0.0  ;;  %v993_v35 = vmax.f32 %v533_v19, 0.0  ;;  %v1191_v6 = vmul.f32 %v3242_v12, %v1056_v39 }
 0x117   :  { %v3378_v40 = vpop.f32.mrb[30].mxu0  ;;  %v3380_v41 = vpop.f32.mrb[30].mxu1 }
 0x118   :  { %1397 = vadd.xlane.f32.xlu1 %v1190_v24  ;;  %1395 = vadd.xlane.f32.xlu0 %v1189_v25  ;;  %v3386_v10 = vpop.f32.mrb[31].mxu0  ;;  %v3388_v46 = vpop.f32.mrb[31].mxu1  ;;  %v1128_v55 = vmul.f32 %v3242_v12, %v993_v35  ;;  %v1127_v56 = vmul.f32 %v3242_v12, %v992_v34  ;;  %v996_v34 = vmax.f32 %v546_v45, 0.0  ;;  %v557_v35 = vadd.f32 %v3324_v52, %v3234_v2 }
 0x11a   :  { %v1131_v26 = vmul.f32 %v3242_v12, %v996_v34 }
 0x11c   :  { %1265 = vadd.xlane.f32.xlu1 %v1124_v48  ;;  %1263 = vadd.xlane.f32.xlu0 %v1123_v49  ;;  %v1057_v49 = vmax.f32 %v789_v30, 0.0  ;;  %v813_v30 = vadd.f32 %v3326_v54, %v3234_v2 }
 0x11d   :  { %v3396_v53 = vpop.f32.mrb[32].mxu0  ;;  %v3398_v59 = vpop.f32.mrb[32].mxu1 }
 0x11e   :  { %v3402_v62 = vpop.f32.mrb[33].mxu0  ;;  %v3404_v63 = vpop.f32.mrb[33].mxu1  ;;  %v1192_v27 = vmul.f32 %v3242_v12, %v1057_v49 }
 0x11f   :  { %v3406_v0 = vpop.f32.mrb[34].mxu0  ;;  %v3408_v1 = vpop.f32.mrb[34].mxu1 }
 0x120   :  { %1393 = vadd.xlane.f32.xlu1 %v1188_v60  ;;  %1391 = vadd.xlane.f32.xlu0 %v1187_v61  ;;  %v3412_v4 = vpop.f32.mrb[35].mxu0  ;;  %v3414_v18 = vpop.f32.mrb[35].mxu1  ;;  %v802_v61 = vadd.f32 %v3234_v2, %v3322_v51 }
 0x122   :  { %v1060_v36 = vmax.f32 %v802_v61, 0.0  ;;  %v826_v61 = vadd.f32 %v3342_v5, %v3234_v2  ;;  %v562_v5 = vadd.f32 %v3234_v2, %v3346_v8 }
 0x124   :  { %1277 = vadd.xlane.f32.xlu1 %v1130_v33  ;;  %1275 = vadd.xlane.f32.xlu0 %v1129_v7  ;;  %v1195_v52 = vmul.f32 %v3242_v12, %v1060_v36  ;;  %v1002_v36 = vmax.f32 %v570_v58, 0.0 }
 0x125   :  { %v3422_v24 = vpop.f32.mrb[36].mxu1  ;;  %v3424_v25 = vpop.f32.mrb[36].mxu0 }
 0x126   :  { %v3430_v9 = vpop.f32.mrb[37].mxu1  ;;  %v3432_v38 = vpop.f32.mrb[37].mxu0  ;;  %v1137_v8 = vmul.f32 %v3242_v12, %v1002_v36  ;;  %v821_v36 = vadd.f32 %v3234_v2, %v3358_v21  ;;  %v586_v21 = vadd.f32 %v3366_v28, %v3234_v2 }
 0x127   :  { %v3434_v42 = vpop.f32.mrb[38].mxu1  ;;  %v3436_v43 = vpop.f32.mrb[38].mxu0 }
 0x128   :  { %1405 = vadd.xlane.f32.xlu1 %v1194_v22  ;;  %1403 = vadd.xlane.f32.xlu0 %v1193_v23  ;;  %v3442_v31 = vpop.f32.mrb[39].mxu1  ;;  %v3444_v48 = vpop.f32.mrb[39].mxu0  ;;  %v1197_v22 = vmul.f32 %v3242_v12, %v1062_v32 }
 0x12c   :  { %1273 = vadd.xlane.f32.xlu1 %v1128_v55  ;;  %1271 = vadd.xlane.f32.xlu0 %v1127_v56  ;;  %v999_v55 = vmax.f32 %v557_v35, 0.0  ;;  %v1063_v56 = vmax.f32 %v813_v30, 0.0  ;;  %v1066_v30 = vmax.f32 %v826_v61, 0.0 }
 0x12d   :  { %v3448_v60 = vpop.f32.mrb[40].mxu1  ;;  %v3450_v44 = vpop.f32.mrb[40].mxu0 }
 0x12e   :  { %v3458_v33 = vpop.f32.mrb[41].mxu1  ;;  %v3460_v7 = vpop.f32.mrb[41].mxu0  ;;  %v1134_v34 = vmul.f32 %v3242_v12, %v999_v55  ;;  %v1198_v35 = vmul.f32 %v3242_v12, %v1063_v56 }
 0x12f   :  { %v3462_v13 = vpop.f32.mrb[42].mxu1  ;;  %v3464_v19 = vpop.f32.mrb[42].mxu0 }
 0x130   :  { %1401 = vadd.xlane.f32.xlu1 %v1192_v27  ;;  %1399 = vadd.xlane.f32.xlu0 %v1191_v6  ;;  %v3468_v23 = vpop.f32.mrb[43].mxu1  ;;  %v3470_v51 = vpop.f32.mrb[43].mxu0 }
 0x134   :  { %1411 = vadd.xlane.f32.xlu1 %v1197_v22  ;;  %1283 = vadd.xlane.f32.xlu0 %v1133_v50  ;;  %v997_v22 = vmax.f32 %v549_v17, 0.0  ;;  %v1061_v50 = vmax.f32 %v805_v47, 0.0 }
 0x135   :  { %v3480_v39 = vpop.f32.mrb[44].mxu1  ;;  %v3482_v49 = vpop.f32.mrb[44].mxu0 }
 0x136   :  { %v3486_v32 = vpop.f32.mrb[45].mxu1  ;;  %v3488_v54 = vpop.f32.mrb[45].mxu0  ;;  %v1132_v17 = vmul.f32 %v3242_v12, %v997_v22  ;;  %v1196_v47 = vmul.f32 %v3242_v12, %v1061_v50  ;;  %v1000_v22 = vmax.f32 %v562_v5, 0.0  ;;  %v573_v50 = vadd.f32 %v3350_v14, %v3234_v2 }
 0x137   :  { %v3490_v45 = vpop.f32.mrb[46].mxu1  ;;  %v3492_v57 = vpop.f32.mrb[46].mxu0 }
 0x138   :  { %4317 = vst [vmem:[#allocation6_spill] sm:$0xff] %v3490_v45  ;;  %1407 = vadd.xlane.f32.xlu1 %v1195_v52  ;;  %1279 = vadd.xlane.f32.xlu0 %v1131_v26  ;;  %v3498_v27 = vpop.f32.mrb[47].mxu1  ;;  %v3500_v6 = vpop.f32.mrb[47].mxu0  ;;  %v818_v26 = vadd.f32 %v3234_v2, %v3348_v11  ;;  %v1003_v5 = vmax.f32 %v573_v50, 0.0  ;;  %v1065_v50 = vmax.f32 %v821_v36, 0.0 }
 0x13a   :  { %v1064_v45 = vmax.f32 %v818_v26, 0.0  ;;  %v1135_v26 = vmul.f32 %v3242_v12, %v1000_v22  ;;  %v1200_v36 = vmul.f32 %v3242_v12, %v1065_v50  ;;  %v589_v50 = vadd.f32 %v3378_v40, %v3234_v2 }
 0x13c   :  { %1285 = vadd.xlane.f32.xlu1 %v1134_v34  ;;  %1413 = vadd.xlane.f32.xlu0 %v1198_v35  ;;  %v1201_v34 = vmul.f32 %v3242_v12, %v1066_v30  ;;  %v1199_v14 = vmul.f32 %v3242_v12, %v1064_v45 }
 0x13d   :  { %v3504_v52 = vpop.f32.mrb[48].mxu1  ;;  %v3506_v3 = vpop.f32.mrb[48].mxu0 }
 0x13e   :  { %v3514_v55 = vpop.f32.mrb[49].mxu1  ;;  %v3516_v56 = vpop.f32.mrb[49].mxu0 }
 0x13f   :  { %v3518_v58 = vpop.f32.mrb[50].mxu1  ;;  %v3520_v61 = vpop.f32.mrb[50].mxu0 }
 0x140   :  { %4318 = vst [vmem:[#allocation7_spill] sm:$0xff] %v3518_v58  ;;  %1281 = vadd.xlane.f32.xlu1 %v1132_v17  ;;  %1409 = vadd.xlane.f32.xlu0 %v1196_v47  ;;  %v3524_v35 = vpop.f32.mrb[51].mxu1  ;;  %v3526_v11 = vpop.f32.mrb[51].mxu0  ;;  %v829_v58 = vadd.f32 %v3352_v15, %v3234_v2  ;;  %v565_v17 = vadd.f32 %v3234_v2, %v3356_v20 }
 0x141   :  { %4319 = vst [vmem:[#allocation8_spill] sm:$0xff] %v3524_v35  ;;  %4320 = vst [vmem:[#allocation9_spill] sm:$0xff] %v3526_v11 }
 0x142   :  { %v1067_v35 = vmax.f32 %v829_v58, 0.0  ;;  %v842_v58 = vadd.f32 %v3368_v29, %v3234_v2  ;;  %v1001_v22 = vmax.f32 %v565_v17, 0.0  ;;  %v578_v29 = vadd.f32 %v3234_v2, %v3374_v37 }
 0x144   :  { %1419 = vadd.xlane.f32.xlu1 %v1201_v34  ;;  %1291 = vadd.xlane.f32.xlu0 %v1137_v8  ;;  %v1136_v17 = vmul.f32 %v3242_v12, %v1001_v22  ;;  %v1004_v22 = vmax.f32 %v578_v29, 0.0  ;;  %v1007_v29 = vmax.f32 %v589_v50, 0.0 }
 0x145   :  { %v3536_v30 = vpop.f32.mrb[52].mxu1  ;;  %v3538_v47 = vpop.f32.mrb[52].mxu0 }
 0x146   :  { %v3542_v11 = vpop.f32.mrb[53].mxu1  ;;  %v3544_v15 = vpop.f32.mrb[53].mxu0 }
 0x147   :  { %4321 = vst [vmem:[#allocation10_spill] sm:$0xff] %v3542_v11  ;;  %4322 = vst [vmem:[#allocation11_spill] sm:$0xff] %v3544_v15  ;;  %v3546_v34 = vpop.f32.mrb[54].mxu1  ;;  %v3548_v20 = vpop.f32.mrb[54].mxu0  ;;  %v1138_v15 = vmul.f32 %v3242_v12, %v1003_v5  ;;  %v1006_v11 = vmax.f32 %v586_v21, 0.0 }
 0x148   :  { %4323 = vst [vmem:[#allocation12_spill] sm:$0xff] %v3546_v34  ;;  %4324 = vst [vmem:[#allocation13_spill] sm:$0xff] %v3548_v20  ;;  %1415 = vadd.xlane.f32.xlu1 %v1199_v14  ;;  %1287 = vadd.xlane.f32.xlu0 %v1135_v26  ;;  %v3554_v8 = vpop.f32.mrb[55].mxu1  ;;  %v3556_v45 = vpop.f32.mrb[55].mxu0  ;;  %v1202_v34 = vmul.f32 %v3242_v12, %v1067_v35  ;;  %v1070_v20 = vmax.f32 %v842_v58, 0.0  ;;  %v834_v26 = vadd.f32 %v3234_v2, %v3376_v16 }
 0x149   :  { %v1141_v37 = vmul.f32 %v3242_v12, %v1006_v11  ;;  %v837_v11 = vadd.f32 %v3234_v2, %v3388_v46  ;;  %v602_v46 = vadd.f32 %v3396_v53, %v3234_v2  ;;  %v858_v53 = vadd.f32 %v3398_v59, %v3234_v2 }
 0x14a   :  { %v1205_v21 = vmul.f32 %v3242_v12, %v1070_v20  ;;  %v597_v59 = vadd.f32 %v3234_v2, %v3412_v4 }
 0x14b   :  { %v1069_v50 = vmax.f32 %v837_v11, 0.0  ;;  %v1074_v11 = vmax.f32 %v858_v53, 0.0  ;;  %v1753_v53 = vlaneseq }
 0x14c   :  { %1293 = vadd.xlane.f32.xlu1 %v1138_v15  ;;  %1421 = vadd.xlane.f32.xlu0 %v1202_v34 }
 0x14d   :  { %v3560_v14 = vpop.f32.mrb[56].mxu1  ;;  %v3562_v28 = vpop.f32.mrb[56].mxu0 }
 0x14e   :  { %v3570_v5 = vpop.f32.mrb[57].mxu1  ;;  %v3572_v35 = vpop.f32.mrb[57].mxu0 }
 0x14f   :  { %4325 = vst [vmem:[#allocation14_spill] sm:$0xff] %v3570_v5  ;;  %v3574_v15 = vpop.f32.mrb[58].mxu1  ;;  %v3576_v34 = vpop.f32.mrb[58].mxu0  ;;  %v1068_v5 = vmax.f32 %v834_v26, 0.0  ;;  %v1139_v26 = vmul.f32 %v3242_v12, %v1004_v22 }
 0x150   :  { %4326 = vst [vmem:[#allocation15_spill] sm:$0xff] %v3574_v15  ;;  %1289 = vadd.xlane.f32.xlu1 %v1136_v17  ;;  %1417 = vadd.xlane.f32.xlu0 %v1200_v36  ;;  %v3580_v58 = vpop.f32.mrb[59].mxu1  ;;  %v3582_v16 = vpop.f32.mrb[59].mxu0  ;;  %v845_v15 = vadd.f32 %v3380_v41, %v3234_v2  ;;  %v581_v17 = vadd.f32 %v3234_v2, %v3386_v10 }
 0x151   :  { %4327 = vst [vmem:[#allocation16_spill] sm:$0xff] %v3580_v58  ;;  %4328 = vst [vmem:[#allocation17_spill] sm:$0xff] %v3582_v16  ;;  %v1203_v40 = vmul.f32 %v3242_v12, %v1068_v5 }
 0x152   :  { %v1071_v58 = vmax.f32 %v845_v15, 0.0  ;;  %v850_v15 = vadd.f32 %v3234_v2, %v3404_v63  ;;  %v1005_v22 = vmax.f32 %v581_v17, 0.0  ;;  %v605_v63 = vadd.f32 %v3406_v0, %v3234_v2 }
 0x153   :  { %v874_v0 = vadd.f32 %v3422_v24, %v3234_v2 }
 0x154   :  { %1427 = vadd.xlane.f32.xlu1 %v1205_v21  ;;  %1299 = vadd.xlane.f32.xlu0 %v1141_v37 }
 0x155   :  { %v3592_v20 = vpop.f32.mrb[60].mxu1  ;;  %v3594_v36 = vpop.f32.mrb[60].mxu0 }
 0x156   :  { %4329 = vst [vmem:[#allocation18_spill] sm:$0xff] %v3592_v20  ;;  %v3598_v16 = vpop.f32.mrb[61].mxu1  ;;  %v3600_v41 = vpop.f32.mrb[61].mxu0  ;;  %v1142_v20 = vmul.f32 %v3242_v12, %v1007_v29  ;;  %v1011_v29 = vmax.f32 %v605_v63, 0.0  ;;  %v618_v63 = vadd.f32 %v3424_v25, %v3234_v2  ;;  %v610_v25 = vadd.f32 %v3234_v2, %v3432_v38 }
 0x157   :  { %4330 = vst [vmem:[#allocation19_spill] sm:$0xff] %v3600_v41  ;;  %v3602_v21 = vpop.f32.mrb[62].mxu1  ;;  %v3604_v10 = vpop.f32.mrb[62].mxu0  ;;  %v1010_v41 = vmax.f32 %v602_v46, 0.0 }
 0x158   :  { %4331 = vst [vmem:[#allocation20_spill] sm:$0xff] %v3602_v21  ;;  %4332 = vst [vmem:[#allocation21_spill] sm:$0xff] %v3604_v10  ;;  %1423 = vadd.xlane.f32.xlu1 %v1203_v40  ;;  %1295 = vadd.xlane.f32.xlu0 %v1139_v26  ;;  %v3610_v37 = vpop.f32.mrb[63].mxu1  ;;  %v3612_v5 = vpop.f32.mrb[63].mxu0  ;;  %v1206_v21 = vmul.f32 %v3242_v12, %v1071_v58  ;;  %v1072_v10 = vmax.f32 %v850_v15, 0.0  ;;  %v1140_v40 = vmul.f32 %v3242_v12, %v1005_v22 }
 0x159   :  { %4333 = vst [vmem:[#allocation22_spill] sm:$0xff] %v3610_v37  ;;  %4334 = vst [vmem:[#allocation23_spill] sm:$0xff] %v3612_v5  ;;  %v1204_v26 = vmul.f32 %v3242_v12, %v1069_v50  ;;  %v1145_v58 = vmul.f32 %v3242_v12, %v1010_v41  ;;  %v1146_v41 = vmul.f32 %v3242_v12, %v1011_v29  ;;  %v1078_v22 = vmax.f32 %v874_v0, 0.0 }
 0x15a   :  { %v1207_v17 = vmul.f32 %v3242_v12, %v1072_v10  ;;  %v1009_v10 = vmax.f32 %v597_v59, 0.0  ;;  %v1209_v15 = vmul.f32 %v3242_v12, %v1074_v11  ;;  %v866_v50 = vadd.f32 %v3234_v2, %v3430_v9 }
 0x15b   :  { %v3646_v9 = vand.u32 127, %v1753_v53  ;;  %v1014_v11 = vmax.f32 %v618_v63, 0.0 }
 0x15c   :  { %1301 = vadd.xlane.f32.xlu1 %v1142_v20  ;;  %1429 = vadd.xlane.f32.xlu0 %v1206_v21  ;;  %v594_v20 = vadd.f32 %v3234_v2, %v3402_v62  ;;  %v861_v21 = vadd.f32 %v3408_v1, %v3234_v2  ;;  %v853_v62 = vadd.f32 %v3234_v2, %v3414_v18 }
 0x15d   :  { %v1144_v24 = vmul.f32 %v3242_v12, %v1009_v10  ;;  %v1766_v10 = vadd.s32 4294967280, %v3646_v9 }
 0x15e   :  { %v1008_v46 = vmax.f32 %v594_v20, 0.0  ;;  %v1075_v4 = vmax.f32 %v861_v21, 0.0  ;;  %v1073_v18 = vmax.f32 %v853_v62, 0.0 }
 0x160   :  { %1297 = vadd.xlane.f32.xlu1 %v1140_v40  ;;  %1425 = vadd.xlane.f32.xlu0 %v1204_v26  ;;  %v1143_v1 = vmul.f32 %v3242_v12, %v1008_v46  ;;  %v621_v40 = vadd.f32 %v3436_v43, %v3234_v2  ;;  %v1213_v26 = vmul.f32 %v3242_v12, %v1078_v22  ;;  %v3654_v46 = vshrl.u32 %v1753_v53, 7 }
 0x161   :  { %v613_v43 = vadd.f32 %v3234_v2, %v3444_v48  ;;  %v1208_v21 = vmul.f32 %v3242_v12, %v1073_v18  ;;  %v1149_v22 = vmul.f32 %v3242_v12, %v1014_v11  ;;  %v877_v48 = vadd.f32 %v3434_v42, %v3234_v2 }
 0x162   :  { %v1015_v20 = vmax.f32 %v621_v40, 0.0  ;;  %v869_v53 = vadd.f32 %v3234_v2, %v3442_v31  ;;  %v3673_v63 = vsub.s32 %v1766_v10, %v3654_v46  ;;  %v3680_v42 = vsub.s32 %v3646_v9, %v3654_v46 }
 0x163   :  { %v1079_v18 = vmax.f32 %v877_v48, 0.0  ;;  %v882_v11 = vadd.f32 %v3234_v2, %v3458_v33  ;;  %v634_v10 = vadd.f32 %v3450_v44, %v3234_v2  ;;  %v637_v33 = vadd.f32 %v3464_v19, %v3234_v2 }
 0x164   :  { %1431 = vadd.xlane.f32.xlu1 %v1207_v17  ;;  %1307 = vadd.xlane.f32.xlu0 %v1145_v58  ;;  %v1076_v17 = vmax.f32 %v866_v50, 0.0  ;;  %v1210_v58 = vmul.f32 %v3242_v12, %v1075_v4  ;;  %v1150_v38 = vmul.f32 %v3242_v12, %v1015_v20  ;;  %v1759_v50 = vadd.s32 4294967288, %v3646_v9 }
 0x165   :  { %v1214_v44 = vmul.f32 %v3242_v12, %v1079_v18  ;;  %v1019_v5 = vmax.f32 %v637_v33, 0.0 }
 0x166   :  { %v1211_v0 = vmul.f32 %v3242_v12, %v1076_v17 }
 0x168   :  { %1309 = vadd.xlane.f32.xlu1 %v1146_v41  ;;  %1435 = vadd.xlane.f32.xlu0 %v1209_v15  ;;  %v1773_v41 = vadd.s32 4294967272, %v3646_v9  ;;  %v890_v15 = vadd.f32 %v3448_v60, %v3234_v2  ;;  %v3670_v60 = vstv %s4315_s4 }
 0x16a   :  { %v3676_v40 = vsub.s32 %v1773_v41, %v3654_v46  ;;  %v1794_v41 = vadd.s32 4294967248, %v3646_v9 }
 0x16c   :  { %1305 = vadd.xlane.f32.xlu1 %v1144_v24  ;;  %1303 = vadd.xlane.f32.xlu0 %v1143_v1  ;;  %v1012_v24 = vmax.f32 %v610_v25, 0.0  ;;  %v1013_v1 = vmax.f32 %v613_v43, 0.0  ;;  %v1801_v43 = vadd.s32 4294967240, %v3646_v9 }
 0x16e   :  { %v1148_v20 = vmul.f32 %v3242_v12, %v1013_v1  ;;  %v1147_v25 = vmul.f32 %v3242_v12, %v1012_v24  ;;  %v1787_v24 = vadd.s32 4294967256, %v3646_v9 }
 0x170   :  { %1443 = vadd.xlane.f32.xlu1 %v1213_v26  ;;  %1437 = vadd.xlane.f32.xlu0 %v1210_v58  ;;  %v1082_v26 = vmax.f32 %v890_v15, 0.0  ;;  %v3683_v58 = vsub.s32 %v1759_v50, %v3654_v46 }
 0x171   :  { %v1372_v29 = vpop.xlane.xlu0 %1371  ;;  %v1244_v59 = vpop.xlane.xlu1 %1243 }
 0x172   :  { %v1499_v48 = vadd.f32 %v3670_v60, %v1244_v59 }
 0x174   :  { %1439 = vadd.xlane.f32.xlu1 %v1211_v0  ;;  %1433 = vadd.xlane.f32.xlu0 %v1208_v21  ;;  %v1077_v0 = vmax.f32 %v869_v53, 0.0  ;;  %v1080_v53 = vmax.f32 %v882_v11, 0.0  ;;  %v1770_v11 = vrot.slane %v1499_v48, %v3673_v63 }
 0x175   :  { %v1246_v62 = vpop.xlane.xlu1 %1245  ;;  %v1240_v4 = vpop.xlane.xlu0 %1239 }
 0x176   :  { %v1497_v21 = vadd.f32 %v3670_v60, %v1240_v4  ;;  %v1500_v1 = vadd.f32 %v3670_v60, %v1246_v62  ;;  %v1212_v59 = vmul.f32 %v3242_v12, %v1077_v0 }
 0x178   :  { %1317 = vadd.xlane.f32.xlu1 %v1150_v38  ;;  %1315 = vadd.xlane.f32.xlu0 %v1149_v22  ;;  %v1217_v38 = vmul.f32 %v3242_v12, %v1082_v26  ;;  %v1563_v22 = vadd.f32 %v3670_v60, %v1372_v29  ;;  %v1758_v26 = vrot.slane %v1497_v21, %v3680_v42  ;;  %v1018_v29 = vmax.f32 %v634_v10, 0.0 }
 0x179   :  { %v1374_v31 = vpop.xlane.xlu1 %1373  ;;  %v1368_v17 = vpop.xlane.xlu0 %1367  ;;  %v626_v21 = vadd.f32 %v3234_v2, %v3460_v7 }
 0x17a   :  { %v1561_v15 = vadd.f32 %v3670_v60, %v1368_v17  ;;  %v2113_v62 = vrot.slane %v1563_v22, %v3673_v63  ;;  %v1153_v7 = vmul.f32 %v3242_v12, %v1018_v29 }
 0x17c   :  { %1313 = vadd.xlane.f32.xlu1 %v1148_v20  ;;  %1311 = vadd.xlane.f32.xlu0 %v1147_v25  ;;  %v1564_v20 = vadd.f32 %v3670_v60, %v1374_v31  ;;  %v2104_v25 = vrot.slane %v1561_v15, %v3680_v42  ;;  %v629_v31 = vadd.f32 %v3234_v2, %v3470_v51  ;;  %v3728_v2 = vld [vmem:[%s4313_s2] ss:$0 sm:$0xff] }
 0x17d   :  { %v1370_v4 = vpop.xlane.xlu1 %1369  ;;  %v1242_v50 = vpop.xlane.xlu0 %1241  ;;  %v1777_v15 = vrot.slane %v1500_v1, %v3676_v40  ;;  %v906_v51 = vadd.f32 %v3728_v2, %v3480_v39  ;;  %v1780_v1 = vadd.s32 4294967264, %v3646_v9  ;;  %v3744_v39 = vsub.s32 %v1794_v41, %v3654_v46 }
 0x17e   :  { %v1562_v17 = vadd.f32 %v3670_v60, %v1370_v4  ;;  %v1498_v19 = vadd.f32 %v3670_v60, %v1242_v50  ;;  %v2118_v22 = vrot.slane %v1564_v20, %v3676_v40  ;;  %v1016_v20 = vmax.f32 %v626_v21, 0.0 }
 0x17f   :  { %v1017_v29 = vmax.f32 %v629_v31, 0.0  ;;  %v885_v41 = vadd.f32 %v3728_v2, %v3468_v23 }
 0x180   :  { %v2108_v18 = vrot.slane %v1562_v17, %v3683_v58  ;;  %v1763_v37 = vrot.slane %v1498_v19, %v3683_v58  ;;  %1451 = vadd.xlane.f32.xlu1 %v1217_v38  ;;  %1445 = vadd.xlane.f32.xlu0 %v1214_v44  ;;  %v1215_v38 = vmul.f32 %v3242_v12, %v1080_v53 }
 0x181   :  { %v1254_v0 = vpop.xlane.xlu1 %1253  ;;  %v1252_v10 = vpop.xlane.xlu0 %1251  ;;  %v893_v53 = vadd.f32 %v3728_v2, %v3462_v13  ;;  %v3750_v13 = vsub.s32 %v1780_v1, %v3654_v46 }
 0x182   :  { %v2109_v4 = vsel %vm1764_vm1, %v2108_v18, %v2104_v25  ;;  %v1765_v33 = vsel %vm1764_vm1, %v1763_v37, %v1758_v26  ;;  %v1154_v37 = vmul.f32 %v3242_v12, %v1019_v5  ;;  %v3747_v12 = vsub.s32 %v1787_v24, %v3654_v46 }
 0x183   :  { %v2114_v48 = vsel %vm1771_vm2, %v2113_v62, %v2109_v4  ;;  %v1772_v50 = vsel %vm1771_vm2, %v1770_v11, %v1765_v33  ;;  %v1086_v5 = vmax.f32 %v906_v51, 0.0  ;;  %v3753_v25 = vadd.s32 4294967208, %v3646_v9  ;;  %v3768_v4 = vld [vmem:[%s4314_s3] ss:$0 sm:$0xff]  ;;  %s2746_s3 = smov [#allocation3]  }
 0x184   :  { %1447 = vadd.xlane.f32.xlu1 %v1215_v38  ;;  %1441 = vadd.xlane.f32.xlu0 %v1212_v59  ;;  %v1779_v44 = vsel %vm1778_vm3, %v1777_v15, %v1772_v50  ;;  %v3738_v26 = vsel %vm1778_vm3, %v2118_v22, %v2114_v48  ;;  %v3741_v59 = vsub.s32 %v1801_v43, %v3654_v46  ;;  %v3756_v43 = vadd.s32 4294967216, %v3646_v9  ;;  %s2439_s25 = sshll.u32 %s2746_s3, 4  ;;  %s2440_s25 = int_to_ptr.vmem [resolvable:$true] %s2439_s25 }
 0x185   :  { %v1382_v17 = vpop.xlane.xlu1 %1381  ;;  %v1380_v19 = vpop.xlane.xlu0 %1379  ;;  %v1083_v18 = vmax.f32 %v893_v53, 0.0  ;;  %v1503_v24 = vadd.f32 %v3670_v60, %v1252_v10  ;;  %v898_v62 = vadd.f32 %v3728_v2, %v3486_v32  ;;  %v1152_v33 = vmul.f32 %v3768_v4, %v1017_v29  ;;  %s2722_s26 = scalar_lea.vmem %s2440_s25, 128  ;;  %p2727_p1 = scmp.lt.s32.totalorder %s2440_s25, %s2440_s25 }
 0x186   :  { %v1151_v23 = vmul.f32 %v3768_v4, %v1016_v20  ;;  %v1504_v10 = vadd.f32 %v3670_v60, %v1254_v0  ;;  %v650_v32 = vadd.f32 %v3728_v2, %v3482_v49  ;;  %v653_v38 = vadd.f32 %v3728_v2, %v3492_v57  ;;  %p2723_p0 = scmp.ne.s32.totalorder %s2440_s25, %s2722_s26  ;;  %p2728_p2 = scmp.lt.s32.totalorder %s2722_s26, %s2722_s26 }
 0x187   :  { %v1221_v50 = vmul.f32 %v3768_v4, %v1086_v5  ;;  %v1798_v51 = vrot.slane %v1503_v24, %v3744_v39  ;;  %v1084_v0 = vmax.f32 %v898_v62, 0.0  ;;  %v1218_v49 = vmul.f32 %v3768_v4, %v1083_v18 }
 0x188   :  { %1325 = vadd.xlane.f32.xlu1 %v1154_v37  ;;  %1323 = vadd.xlane.f32.xlu0 %v1153_v7  ;;  %v1081_v7 = vmax.f32 %v885_v41, 0.0  ;;  %v1567_v57 = vadd.f32 %v3670_v60, %v1380_v19  ;;  %v1568_v5 = vadd.f32 %v3670_v60, %v1382_v17  ;;  %v1022_v24 = vmax.f32 %v650_v32, 0.0  ;;  %p2729_p3 = por %p2728_p2, %p2727_p1 }
 0x189   :  { %v1250_v11 = vpop.xlane.xlu1 %1249  ;;  %v1248_v21 = vpop.xlane.xlu0 %1247  ;;  %v1023_v18 = vmax.f32 %v653_v38, 0.0  ;;  %v642_v19 = vadd.f32 %v3728_v2, %v3488_v54  ;;  %v1815_v17 = vadd.s32 4294967224, %v3646_v9  ;;  %v645_v38 = vadd.f32 %v3728_v2, %v3500_v6 }
 0x18a   :  { %v1502_v31 = vadd.f32 %v3670_v60, %v1250_v11  ;;  %v1501_v15 = vadd.f32 %v3670_v60, %v1248_v21  ;;  %v1805_v11 = vrot.slane %v1504_v10, %v3741_v59  ;;  %v2133_v10 = vrot.slane %v1567_v57, %v3744_v39  ;;  %p2730_p4 = pnand %p2729_p3, %p2723_p0 }
 0x18b   :  { %v2138_v54 = vrot.slane %v1568_v5, %v3741_v59  ;;  %v1808_v6 = vadd.s32 4294967232, %v3646_v9  ;;  %v1021_v57 = vmax.f32 %v645_v38, 0.0  ;;  %v3825_v5 = vsub.s32 %v1815_v17, %v3654_v46 }
 0x18c   :  { %v1791_v22 = vrot.slane %v1502_v31, %v3747_v12  ;;  %v1784_v48 = vrot.slane %v1501_v15, %v3750_v13  ;;  %1321 = vadd.xlane.f32.xlu1 %v1152_v33  ;;  %1319 = vadd.xlane.f32.xlu0 %v1151_v23  ;;  %v1216_v33 = vmul.f32 %v3768_v4, %v1081_v7 }
 0x18d   :  { %v1378_v37 = vpop.xlane.xlu1 %1377  ;;  %v1376_v1 = vpop.xlane.xlu0 %1375  ;;  %v1157_v7 = vmul.f32 %v3768_v4, %v1022_v24 }
 0x18e   :  { %v1786_v53 = vsel %vm1785_vm4, %v1784_v48, %v1779_v44  ;;  %v1566_v20 = vadd.f32 %v3670_v60, %v1378_v37  ;;  %v1565_v29 = vadd.f32 %v3670_v60, %v1376_v1  ;;  %v901_v48 = vadd.f32 %v3728_v2, %v3498_v27 }
 0x18f   :  { %v1793_v41 = vsel %vm1792_vm5, %v1791_v22, %v1786_v53  ;;  %v1219_v22 = vmul.f32 %v3768_v4, %v1084_v0  ;;  %v1020_v27 = vmax.f32 %v642_v19, 0.0 }
 0x190   :  { %v2128_v62 = vrot.slane %v1566_v20, %v3747_v12  ;;  %v2123_v21 = vrot.slane %v1565_v29, %v3750_v13  ;;  %1459 = vadd.xlane.f32.xlu1 %v1221_v50  ;;  %1453 = vadd.xlane.f32.xlu0 %v1218_v49  ;;  %v1800_v44 = vsel %vm1799_vm6, %v1798_v51, %v1793_v41  ;;  %v1085_v53 = vmax.f32 %v901_v48, 0.0 }
 0x191   :  { %v1262_v31 = vpop.xlane.xlu1 %1261  ;;  %v1260_v15 = vpop.xlane.xlu0 %1259  ;;  %v1807_v23 = vsel %vm1806_vm7, %v1805_v11, %v1800_v44  ;;  %v922_v51 = vadd.f32 %v3728_v2, %v3504_v52  ;;  %v3816_v20 = vsub.s32 %v3753_v25, %v3654_v46  ;;  %v666_v52 = vadd.f32 %v3728_v2, %v3506_v3 }
 0x192   :  { %v2124_v32 = vsel %vm1785_vm4, %v2123_v21, %v3738_v26  ;;  %v1158_v26 = vmul.f32 %v3768_v4, %v1023_v18  ;;  %v3822_v29 = vsub.s32 %v3756_v43, %v3654_v46  ;;  %v3828_v41 = vsub.s32 %v1808_v6, %v3654_v46 }
 0x193   :  { %v2129_v50 = vsel %vm1792_vm5, %v2128_v62, %v2124_v32  ;;  %v1090_v11 = vmax.f32 %v922_v51, 0.0  ;;  %v1507_v24 = vadd.f32 %v3670_v60, %v1260_v15  ;;  %v914_v25 = vadd.f32 %v3728_v2, %v3514_v55 }
 0x194   :  { %1455 = vadd.xlane.f32.xlu1 %v1219_v22  ;;  %1449 = vadd.xlane.f32.xlu0 %v1216_v33  ;;  %v2134_v0 = vsel %vm1799_vm6, %v2133_v10, %v2129_v50  ;;  %v1156_v18 = vmul.f32 %v3768_v4, %v1021_v57  ;;  %v1155_v44 = vmul.f32 %v3768_v4, %v1020_v27  ;;  %v1026_v33 = vmax.f32 %v666_v52, 0.0 }
 0x195   :  { %v1390_v37 = vpop.xlane.xlu1 %1389  ;;  %v1388_v1 = vpop.xlane.xlu0 %1387  ;;  %v2139_v49 = vsel %vm1806_vm7, %v2138_v54, %v2134_v0  ;;  %v1508_v19 = vadd.f32 %v3670_v60, %v1262_v31  ;;  %v1220_v15 = vmul.f32 %v3768_v4, %v1085_v53  ;;  %v1225_v10 = vmul.f32 %v3768_v4, %v1090_v11  ;;  %v4335_v53 = vld [vmem:[#allocation7_spill] sm:$0xff] }
 0x196   :  { %v1826_v32 = vrot.slane %v1507_v24, %v3822_v29  ;;  %v1088_v38 = vmax.f32 %v914_v25, 0.0  ;;  %v658_v22 = vadd.f32 %v3728_v2, %v3516_v56  ;;  %v669_v31 = vadd.f32 %v3728_v2, %v3520_v61  ;;  %v4336_v24 = vld [vmem:[#allocation9_spill] sm:$0xff] }
 0x197   :  { %v1571_v50 = vadd.f32 %v3670_v60, %v1388_v1  ;;  %v1833_v6 = vrot.slane %v1508_v19, %v3816_v20  ;;  %v1572_v0 = vadd.f32 %v3670_v60, %v1390_v37  ;;  %v1161_v56 = vmul.f32 %v3768_v4, %v1026_v33  ;;  %v4337_v33 = vld [vmem:[#allocation8_spill] sm:$0xff] }
 0x198   :  { %1333 = vadd.xlane.f32.xlu1 %v1158_v26  ;;  %1331 = vadd.xlane.f32.xlu0 %v1157_v7  ;;  %v925_v52 = vadd.f32 %v3728_v2, %v4335_v53  ;;  %v1024_v11 = vmax.f32 %v658_v22, 0.0  ;;  %v661_v37 = vadd.f32 %v3728_v2, %v4336_v24 }
 0x199   :  { %v1258_v62 = vpop.xlane.xlu1 %1257  ;;  %v1256_v3 = vpop.xlane.xlu0 %1255  ;;  %v2158_v19 = vrot.slane %v1572_v0, %v3816_v20 }
 0x19a   :  { %v1506_v43 = vadd.f32 %v3670_v60, %v1258_v62  ;;  %v1505_v21 = vadd.f32 %v3670_v60, %v1256_v3 }
 0x19c   :  { %v1819_v55 = vrot.slane %v1506_v43, %v3825_v5  ;;  %v1812_v17 = vrot.slane %v1505_v21, %v3828_v41  ;;  %1329 = vadd.xlane.f32.xlu1 %v1156_v18  ;;  %1327 = vadd.xlane.f32.xlu0 %v1155_v44  ;;  %v2153_v43 = vrot.slane %v1571_v50, %v3822_v29  ;;  %v1027_v21 = vmax.f32 %v669_v31, 0.0 }
 0x19d   :  { %v1386_v54 = vpop.xlane.xlu1 %1385  ;;  %v1384_v48 = vpop.xlane.xlu0 %1383  ;;  %v1223_v44 = vmul.f32 %v3768_v4, %v1088_v38  ;;  %v1159_v50 = vmul.f32 %v3768_v4, %v1024_v11 }
 0x19e   :  { %v1814_v7 = vsel %vm1813_vm8, %v1812_v17, %v1807_v23  ;;  %v1570_v51 = vadd.f32 %v3670_v60, %v1386_v54  ;;  %v1569_v26 = vadd.f32 %v3670_v60, %v1384_v48  ;;  %v1857_v23 = vadd.s32 4294967176, %v3646_v9 }
 0x19f   :  { %v1821_v27 = vsel %vm1820_vm9, %v1819_v55, %v1814_v7  ;;  %v1850_v17 = vadd.s32 4294967184, %v3646_v9  ;;  %v1091_v48 = vmax.f32 %v925_v52, 0.0  ;;  %v1162_v7 = vmul.f32 %v3768_v4, %v1027_v21 }
 0x1a0   :  { %v2148_v61 = vrot.slane %v1570_v51, %v3825_v5  ;;  %v2143_v57 = vrot.slane %v1569_v26, %v3828_v41  ;;  %1467 = vadd.xlane.f32.xlu1 %v1225_v10  ;;  %1457 = vadd.xlane.f32.xlu0 %v1220_v15  ;;  %v1828_v1 = vsel %vm1827_vm10, %v1826_v32, %v1821_v27  ;;  %v1843_v32 = vadd.s32 4294967192, %v3646_v9 }
 0x1a1   :  { %v1270_v25 = vpop.xlane.xlu1 %1269  ;;  %v1268_v62 = vpop.xlane.xlu0 %1267  ;;  %v1835_v3 = vsel %vm1834_vm11, %v1833_v6, %v1828_v1  ;;  %v917_v15 = vadd.f32 %v3728_v2, %v4337_v33  ;;  %v938_v10 = vadd.f32 %v3728_v2, %v3536_v30  ;;  %v1025_v51 = vmax.f32 %v661_v37, 0.0  ;;  %v4339_v33 = vld [vmem:[#allocation11_spill] sm:$0xff] }
 0x1a2   :  { %v2144_v18 = vsel %vm1813_vm8, %v2143_v57, %v2139_v49  ;;  %v1836_v49 = vadd.s32 4294967200, %v3646_v9  ;;  %v3883_v30 = vsub.s32 %v1857_v23, %v3654_v46  ;;  %v682_v9 = vadd.f32 %v3728_v2, %v3538_v47  ;;  %v4338_v57 = vld [vmem:[#allocation10_spill] sm:$0xff] }
 0x1a3   :  { %v2149_v55 = vsel %vm1820_vm9, %v2148_v61, %v2144_v18  ;;  %v1089_v26 = vmax.f32 %v917_v15, 0.0  ;;  %v3888_v6 = vsub.s32 %v1850_v17, %v3654_v46  ;;  %v1094_v0 = vmax.f32 %v938_v10, 0.0 }
 0x1a4   :  { %1463 = vadd.xlane.f32.xlu1 %v1223_v44  ;;  %1339 = vadd.xlane.f32.xlu0 %v1161_v56  ;;  %v2154_v38 = vsel %vm1827_vm10, %v2153_v43, %v2149_v55  ;;  %v3891_v27 = vsub.s32 %v1843_v32, %v3654_v46  ;;  %v3894_v56 = vsub.s32 %v1836_v49, %v3654_v46  ;;  %v4340_v55 = vld [vmem:[#allocation13_spill] sm:$0xff] }
 0x1a5   :  { %v1398_v22 = vpop.xlane.xlu1 %1397  ;;  %v1396_v31 = vpop.xlane.xlu0 %1395  ;;  %v3878_v54 = vsel %vm1834_vm11, %v2158_v19, %v2154_v38  ;;  %v1511_v61 = vadd.f32 %v3670_v60, %v1268_v62  ;;  %v930_v23 = vadd.f32 %v3728_v2, %v4338_v57  ;;  %v1226_v53 = vmul.f32 %v3768_v4, %v1091_v48 }
 0x1a6   :  { %v1160_v52 = vmul.f32 %v3768_v4, %v1025_v51  ;;  %v1224_v46 = vmul.f32 %v3768_v4, %v1089_v26  ;;  %v1512_v37 = vadd.f32 %v3670_v60, %v1270_v25  ;;  %v1030_v62 = vmax.f32 %v682_v9, 0.0 }
 0x1a7   :  { %v1229_v43 = vmul.f32 %v3768_v4, %v1094_v0  ;;  %v1854_v44 = vrot.slane %v1511_v61, %v3888_v6  ;;  %v1092_v19 = vmax.f32 %v930_v23, 0.0  ;;  %v674_v15 = vadd.f32 %v3728_v2, %v4339_v33 }
 0x1a8   :  { %1341 = vadd.xlane.f32.xlu1 %v1162_v7  ;;  %1335 = vadd.xlane.f32.xlu0 %v1159_v50  ;;  %v685_v25 = vadd.f32 %v3728_v2, %v4340_v55  ;;  %v1575_v32 = vadd.f32 %v3670_v60, %v1396_v31  ;;  %v1861_v50 = vrot.slane %v1512_v37, %v3883_v30 }
 0x1a9   :  { %v1266_v1 = vpop.xlane.xlu1 %1265  ;;  %v1264_v47 = vpop.xlane.xlu0 %1263  ;;  %v1576_v7 = vadd.f32 %v3670_v60, %v1398_v22  ;;  %v1165_v26 = vmul.f32 %v3768_v4, %v1030_v62  ;;  %v1028_v23 = vmax.f32 %v674_v15, 0.0  ;;  %v677_v22 = vadd.f32 %v3728_v2, %v3556_v45 }
 0x1aa   :  { %v1510_v11 = vadd.f32 %v3670_v60, %v1266_v1  ;;  %v1509_v24 = vadd.f32 %v3670_v60, %v1264_v47  ;;  %v933_v37 = vadd.f32 %v3728_v2, %v3554_v8  ;;  %v954_v45 = vadd.f32 %v3728_v2, %v3560_v14 }
 0x1ab   :  { %v1029_v8 = vmax.f32 %v677_v22, 0.0  ;;  %v698_v55 = vadd.f32 %v3728_v2, %v3562_v28 }
 0x1ac   :  { %v1847_v21 = vrot.slane %v1510_v11, %v3891_v27  ;;  %v1840_v18 = vrot.slane %v1509_v24, %v3894_v56  ;;  %1337 = vadd.xlane.f32.xlu1 %v1160_v52  ;;  %1469 = vadd.xlane.f32.xlu0 %v1226_v53  ;;  %v2173_v53 = vrot.slane %v1575_v32, %v3888_v6  ;;  %v1031_v11 = vmax.f32 %v685_v25, 0.0 }
 0x1ad   :  { %v1394_v17 = vpop.xlane.xlu1 %1393  ;;  %v1392_v10 = vpop.xlane.xlu0 %1391  ;;  %v1227_v52 = vmul.f32 %v3768_v4, %v1092_v19  ;;  %v1163_v19 = vmul.f32 %v3768_v4, %v1028_v23  ;;  %v1093_v15 = vmax.f32 %v933_v37, 0.0  ;;  %v1098_v25 = vmax.f32 %v954_v45, 0.0 }
 0x1ae   :  { %v1842_v49 = vsel %vm1841_vm12, %v1840_v18, %v1835_v3  ;;  %v1574_v38 = vadd.f32 %v3670_v60, %v1394_v17  ;;  %v1573_v48 = vadd.f32 %v3670_v60, %v1392_v10  ;;  %v4341_v3 = vld [vmem:[#allocation12_spill] sm:$0xff]  ;;  %v1166_v33 = vmul.f32 %v3768_v4, %v1031_v11  ;;  %v4342_v10 = vld [vmem:[#allocation14_spill] sm:$0xff] }
 0x1af   :  { %v1849_v51 = vsel %vm1848_vm13, %v1847_v21, %v1842_v49  ;;  %v941_v61 = vadd.f32 %v3728_v2, %v4341_v3  ;;  %v946_v32 = vadd.f32 %v3728_v2, %v4342_v10 }
 0x1b0   :  { %v1856_v9 = vsel %vm1855_vm14, %v1854_v44, %v1849_v51  ;;  %v2168_v0 = vrot.slane %v1574_v38, %v3891_v27  ;;  %v2163_v31 = vrot.slane %v1573_v48, %v3894_v56  ;;  %1475 = vadd.xlane.f32.xlu1 %v1229_v43  ;;  %1465 = vadd.xlane.f32.xlu0 %v1224_v46 }
 0x1b1   :  { %v3927_v57 = vsel %vm1862_vm15, %v1861_v50, %v1856_v9  ;;  %v1278_v1 = vpop.xlane.xlu1 %1277  ;;  %v1276_v47 = vpop.xlane.xlu0 %1275  ;;  %v2178_v46 = vrot.slane %v1576_v7, %v3883_v30  ;;  %v1164_v50 = vmul.f32 %v3768_v4, %v1029_v8  ;;  %v1228_v51 = vmul.f32 %v3768_v4, %v1093_v15 }
 0x1b2   :  { %v2164_v24 = vsel %vm1841_vm12, %v2163_v31, %v3878_v54  ;;  %v1095_v54 = vmax.f32 %v941_v61, 0.0  ;;  %v1516_v14 = vadd.f32 %v3670_v60, %v1278_v1  ;;  %v1515_v17 = vadd.f32 %v3670_v60, %v1276_v47 }
 0x1b3   :  { %v2169_v62 = vsel %vm1848_vm13, %v2168_v0, %v2164_v24  ;;  %v690_v9 = vadd.f32 %v3728_v2, %v3572_v35  ;;  %v701_v0 = vadd.f32 %v3728_v2, %v3576_v34  ;;  %v1233_v31 = vmul.f32 %v3768_v4, %v1098_v25 }
 0x1b4   :  { %v2174_v43 = vsel %vm1855_vm14, %v2173_v53, %v2169_v62  ;;  %1471 = vadd.xlane.f32.xlu1 %v1227_v52  ;;  %1347 = vadd.xlane.f32.xlu0 %v1165_v26  ;;  %v1230_v48 = vmul.f32 %v3768_v4, %v1095_v54  ;;  %v1034_v26 = vmax.f32 %v698_v55, 0.0  ;;  %v1881_v23 = vrot.slane %v1516_v14, %v3676_v40 }
 0x1b5   :  { %v1406_v21 = vpop.xlane.xlu1 %1405  ;;  %v1404_v18 = vpop.xlane.xlu0 %1403  ;;  %v3943_v44 = vsel %vm1862_vm15, %v2178_v46, %v2174_v43  ;;  %v1876_v22 = vrot.slane %v1515_v17, %v3673_v63  ;;  %v1096_v47 = vmax.f32 %v946_v32, 0.0  ;;  %v1035_v17 = vmax.f32 %v701_v0, 0.0 }
 0x1b6   :  { %v1579_v1 = vadd.f32 %v3670_v60, %v1404_v18  ;;  %v1580_v52 = vadd.f32 %v3670_v60, %v1406_v21  ;;  %v1169_v37 = vmul.f32 %v3768_v4, %v1034_v26  ;;  %v4343_v18 = vld [vmem:[#allocation15_spill] sm:$0xff] }
 0x1b7   :  { %v957_v54 = vadd.f32 %v3728_v2, %v4343_v18  ;;  %v1231_v14 = vmul.f32 %v3768_v4, %v1096_v47 }
 0x1b8   :  { %1349 = vadd.xlane.f32.xlu1 %v1166_v33  ;;  %1343 = vadd.xlane.f32.xlu0 %v1163_v19  ;;  %v2192_v21 = vrot.slane %v1579_v1, %v3673_v63  ;;  %v1032_v19 = vmax.f32 %v690_v9, 0.0  ;;  %v4344_v33 = vld [vmem:[#allocation17_spill] sm:$0xff]  ;;  %v2197_v25 = vrot.slane %v1580_v52, %v3676_v40  ;;  %v1170_v9 = vmul.f32 %v3768_v4, %v1035_v17 }
 0x1b9   :  { %v1274_v49 = vpop.xlane.xlu1 %1273  ;;  %v1272_v38 = vpop.xlane.xlu0 %1271  ;;  %v693_v8 = vadd.f32 %v3728_v2, %v4344_v33  ;;  %v4346_v1 = vld [vmem:[#allocation21_spill] sm:$0xff] }
 0x1ba   :  { %v1514_v7 = vadd.f32 %v3670_v60, %v1274_v49  ;;  %v1513_v28 = vadd.f32 %v3670_v60, %v1272_v38  ;;  %v962_v38 = vadd.f32 %v3728_v2, %v3598_v16  ;;  %v717_v47 = vadd.f32 %v3728_v2, %v4346_v1 }
 0x1bb   :  { %v1033_v0 = vmax.f32 %v693_v8, 0.0 }
 0x1bc   :  { %v1871_v3 = vrot.slane %v1514_v7, %v3683_v58  ;;  %v1867_v61 = vrot.slane %v1513_v28, %v3680_v42  ;;  %1345 = vadd.xlane.f32.xlu1 %v1164_v50  ;;  %1477 = vadd.xlane.f32.xlu0 %v1230_v48  ;;  %v1099_v48 = vmax.f32 %v957_v54, 0.0  ;;  %v4345_v50 = vld [vmem:[#allocation16_spill] sm:$0xff]  ;;  %v1167_v28 = vmul.f32 %v3768_v4, %v1032_v19  ;;  %v4347_v54 = vld [vmem:[#allocation19_spill] sm:$0xff] }
 0x1bd   :  { %v1402_v53 = vpop.xlane.xlu1 %1401  ;;  %v1400_v35 = vpop.xlane.xlu0 %1399  ;;  %v949_v7 = vadd.f32 %v3728_v2, %v4345_v50  ;;  %v706_v19 = vadd.f32 %v3728_v2, %v4347_v54 }
 0x1be   :  { %v1872_v34 = vsel %vm1764_vm1, %v1871_v3, %v1867_v61  ;;  %v1578_v11 = vadd.f32 %v3670_v60, %v1402_v53  ;;  %v1577_v24 = vadd.f32 %v3670_v60, %v1400_v35  ;;  %v714_v61 = vadd.f32 %v3728_v2, %v3594_v36 }
 0x1bf   :  { %v1877_v46 = vsel %vm1771_vm2, %v1876_v22, %v1872_v34  ;;  %v1100_v22 = vmax.f32 %v962_v38, 0.0  ;;  %v1097_v53 = vmax.f32 %v949_v7, 0.0  ;;  %v1234_v34 = vmul.f32 %v3768_v4, %v1099_v48 }
 0x1c0   :  { %v2187_v62 = vrot.slane %v1578_v11, %v3683_v58  ;;  %v2183_v43 = vrot.slane %v1577_v24, %v3680_v42  ;;  %1483 = vadd.xlane.f32.xlu1 %v1233_v31  ;;  %1473 = vadd.xlane.f32.xlu0 %v1228_v51  ;;  %v1882_v45 = vsel %vm1778_vm3, %v1881_v23, %v1877_v46  ;;  %v1038_v46 = vmax.f32 %v714_v61, 0.0 }
 0x1c1   :  { %v1412_v15 = vpop.xlane.xlu1 %1411  ;;  %v1284_v55 = vpop.xlane.xlu0 %1283  ;;  %v1168_v11 = vmul.f32 %v3768_v4, %v1033_v0 }
 0x1c2   :  { %v2188_v10 = vsel %vm1764_vm1, %v2187_v62, %v2183_v43  ;;  %v1039_v62 = vmax.f32 %v717_v47, 0.0  ;;  %v1232_v43 = vmul.f32 %v3768_v4, %v1097_v53  ;;  %v1519_v18 = vadd.f32 %v3670_v60, %v1284_v55 }
 0x1c3   :  { %v2193_v32 = vsel %vm1771_vm2, %v2192_v21, %v2188_v10  ;;  %v1583_v21 = vadd.f32 %v3670_v60, %v1412_v15  ;;  %v1173_v15 = vmul.f32 %v3768_v4, %v1038_v46 }
 0x1c4   :  { %1479 = vadd.xlane.f32.xlu1 %v1231_v14  ;;  %1355 = vadd.xlane.f32.xlu0 %v1169_v37  ;;  %v2198_v49 = vsel %vm1778_vm3, %v2197_v25, %v2193_v32  ;;  %v1235_v37 = vmul.f32 %v3768_v4, %v1100_v22  ;;  %v4349_v32 = vld [vmem:[#allocation6_spill] sm:$0xff]  ;;  %v1174_v38 = vmul.f32 %v3768_v4, %v1039_v62 }
 0x1c5   :  { %v1408_v51 = vpop.xlane.xlu1 %1407  ;;  %v1280_v26 = vpop.xlane.xlu0 %1279  ;;  %v2212_v7 = vrot.slane %v1583_v21, %v3744_v39 }
 0x1c6   :  { %v1581_v31 = vadd.f32 %v3670_v60, %v1408_v51  ;;  %v1517_v3 = vadd.f32 %v3670_v60, %v1280_v26  ;;  %v4350_v51 = vld [vmem:[#allocation22_spill] sm:$0xff] }
 0x1c7   :  { %v965_v26 = vadd.f32 %v3728_v2, %v4350_v51 }
 0x1c8   :  { %v2202_v16 = vrot.slane %v1581_v31, %v3750_v13  ;;  %v1886_v23 = vrot.slane %v1517_v3, %v3750_v13  ;;  %1357 = vadd.xlane.f32.xlu1 %v1170_v9  ;;  %1351 = vadd.xlane.f32.xlu0 %v1167_v28  ;;  %v1896_v28 = vrot.slane %v1519_v18, %v3744_v39  ;;  %v1036_v9 = vmax.f32 %v706_v19, 0.0 }
 0x1c9   :  { %v1286_v35 = vpop.xlane.xlu1 %1285  ;;  %v1414_v52 = vpop.xlane.xlu0 %1413 }
 0x1ca   :  { %v2203_v24 = vsel %vm1785_vm4, %v2202_v16, %v2198_v49  ;;  %v1887_v36 = vsel %vm1785_vm4, %v1886_v23, %v1882_v45  ;;  %v1584_v25 = vadd.f32 %v3670_v60, %v1414_v52  ;;  %v4348_v45 = vld [vmem:[#allocation23_spill] sm:$0xff]  ;;  %v909_v49 = vadd.f32 %v3728_v2, %v4349_v32  ;;  %v4351_v52 = vld [vmem:[#allocation18_spill] sm:$0xff] }
 0x1cb   :  { %v709_v14 = vadd.f32 %v3728_v2, %v4348_v45  ;;  %v1520_v55 = vadd.f32 %v3670_v60, %v1286_v35 }
 0x1cc   :  { %1353 = vadd.xlane.f32.xlu1 %v1168_v11  ;;  %1485 = vadd.xlane.f32.xlu0 %v1234_v34  ;;  %v2217_v3 = vrot.slane %v1584_v25, %v3741_v59  ;;  %v1087_v53 = vmax.f32 %v909_v49, 0.0  ;;  %v970_v34 = vadd.f32 %v3728_v2, %v4351_v52  ;;  %v4352_v11 = vld [vmem:[#allocation20_spill] sm:$0xff] }
 0x1cd   :  { %v1282_v33 = vpop.xlane.xlu1 %1281  ;;  %v1410_v8 = vpop.xlane.xlu0 %1409  ;;  %v1037_v61 = vmax.f32 %v709_v14, 0.0  ;;  %v1901_v22 = vrot.slane %v1520_v55, %v3741_v59  ;;  %v973_v46 = vadd.f32 %v3728_v2, %v4352_v11 }
 0x1ce   :  { %v1518_v17 = vadd.f32 %v3670_v60, %v1282_v33  ;;  %v1582_v10 = vadd.f32 %v3670_v60, %v1410_v8  ;;  %v1102_v2 = vmax.f32 %v970_v34, 0.0  ;;  %v1222_v14 = vmul.f32 %v3768_v4, %v1087_v53 }
 0x1cf   :  { %v1172_v21 = vmul.f32 %v3768_v4, %v1037_v61  ;;  %v1103_v8 = vmax.f32 %v973_v46, 0.0 }
 0x1d0   :  { %v1891_v48 = vrot.slane %v1518_v17, %v3747_v12  ;;  %v2207_v50 = vrot.slane %v1582_v10, %v3747_v12  ;;  %1487 = vadd.xlane.f32.xlu1 %v1235_v37  ;;  %1481 = vadd.xlane.f32.xlu0 %v1232_v43  ;;  %v1171_v43 = vmul.f32 %v3768_v4, %v1036_v9 }
 0x1d1   :  { %v1420_v0 = vpop.xlane.xlu1 %1419  ;;  %v1292_v31 = vpop.xlane.xlu0 %1291  ;;  %v1237_v49 = vmul.f32 %v3768_v4, %v1102_v2 }
 0x1d2   :  { %v1892_v16 = vsel %vm1792_vm5, %v1891_v48, %v1887_v36  ;;  %v2208_v23 = vsel %vm1792_vm5, %v2207_v50, %v2203_v24  ;;  %v1101_v36 = vmax.f32 %v965_v26, 0.0  ;;  %v1587_v55 = vadd.f32 %v3670_v60, %v1420_v0 }
 0x1d3   :  { %v1897_v1 = vsel %vm1799_vm6, %v1896_v28, %v1892_v16  ;;  %v2213_v47 = vsel %vm1799_vm6, %v2212_v7, %v2208_v23 }
 0x1d4   :  { %1365 = vadd.xlane.f32.xlu1 %v1174_v38  ;;  %1363 = vadd.xlane.f32.xlu0 %v1173_v15  ;;  %v2218_v35 = vsel %vm1806_vm7, %v2217_v3, %v2213_v47  ;;  %v1902_v24 = vsel %vm1806_vm7, %v1901_v22, %v1897_v1  ;;  %v1236_v17 = vmul.f32 %v3768_v4, %v1101_v36 }
 0x1d5   :  { %v1416_v37 = vpop.xlane.xlu1 %1415  ;;  %v1288_v62 = vpop.xlane.xlu0 %1287  ;;  %v1238_v15 = vmul.f32 %v3768_v4, %v1103_v8  ;;  %v1523_v38 = vadd.f32 %v3670_v60, %v1292_v31  ;;  %v2232_v4 = vrot.slane %v1587_v55, %v3822_v29 }
 0x1d6   :  { %v1585_v18 = vadd.f32 %v3670_v60, %v1416_v37  ;;  %v1521_v54 = vadd.f32 %v3670_v60, %v1288_v62 }
 0x1d7   :  { %v1916_v0 = vrot.slane %v1523_v38, %v3822_v29 }
 0x1d8   :  { %v2222_v19 = vrot.slane %v1585_v18, %v3828_v41  ;;  %v1906_v33 = vrot.slane %v1521_v54, %v3828_v41  ;;  %1361 = vadd.xlane.f32.xlu1 %v1172_v21  ;;  %1359 = vadd.xlane.f32.xlu0 %v1171_v43 }
 0x1d9   :  { %v1294_v25 = vpop.xlane.xlu1 %1293  ;;  %v1422_v45 = vpop.xlane.xlu0 %1421 }
 0x1da   :  { %v2223_v10 = vsel %vm1813_vm8, %v2222_v19, %v2218_v35  ;;  %v1907_v32 = vsel %vm1813_vm8, %v1906_v33, %v1902_v24  ;;  %v1524_v7 = vadd.f32 %v3670_v60, %v1294_v25  ;;  %v1588_v28 = vadd.f32 %v3670_v60, %v1422_v45 }
 0x1dc   :  { %1461 = vadd.xlane.f32.xlu1 %v1222_v14  ;;  %1489 = vadd.xlane.f32.xlu0 %v1236_v17  ;;  %v1921_v16 = vrot.slane %v1524_v7, %v3816_v20  ;;  %v2237_v23 = vrot.slane %v1588_v28, %v3816_v20 }
 0x1dd   :  { %v1290_v48 = vpop.xlane.xlu1 %1289  ;;  %v1418_v50 = vpop.xlane.xlu0 %1417 }
 0x1de   :  { %v1522_v51 = vadd.f32 %v3670_v60, %v1290_v48  ;;  %v1586_v26 = vadd.f32 %v3670_v60, %v1418_v50 }
 0x1e0   :  { %v1911_v9 = vrot.slane %v1522_v51, %v3825_v5  ;;  %v2227_v3 = vrot.slane %v1586_v26, %v3825_v5  ;;  %1493 = vadd.xlane.f32.xlu1 %v1238_v15  ;;  %1491 = vadd.xlane.f32.xlu0 %v1237_v49 }
 0x1e1   :  { %v1428_v31 = vpop.xlane.xlu1 %1427  ;;  %v1300_v61 = vpop.xlane.xlu0 %1299 }
 0x1e2   :  { %v1912_v22 = vsel %vm1820_vm9, %v1911_v9, %v1907_v32  ;;  %v2228_v1 = vsel %vm1820_vm9, %v2227_v3, %v2223_v10  ;;  %v1591_v54 = vadd.f32 %v3670_v60, %v1428_v31  ;;  %v1527_v19 = vadd.f32 %v3670_v60, %v1300_v61 }
 0x1e3   :  { %v1917_v47 = vsel %vm1827_vm10, %v1916_v0, %v1912_v22  ;;  %v2233_v53 = vsel %vm1827_vm10, %v2232_v4, %v2228_v1 }
 0x1e4   :  { %v2238_v35 = vsel %vm1834_vm11, %v2237_v23, %v2233_v53  ;;  %v1922_v52 = vsel %vm1834_vm11, %v1921_v16, %v1917_v47  ;;  %v2252_v32 = vrot.slane %v1591_v54, %v3888_v6  ;;  %v1936_v49 = vrot.slane %v1527_v19, %v3888_v6 }
 0x1e5   :  { %v1424_v34 = vpop.xlane.xlu1 %1423  ;;  %v1296_v11 = vpop.xlane.xlu0 %1295 }
 0x1e6   :  { %v1589_v46 = vadd.f32 %v3670_v60, %v1424_v34  ;;  %v1525_v36 = vadd.f32 %v3670_v60, %v1296_v11 }
 0x1e8   :  { %v2242_v37 = vrot.slane %v1589_v46, %v3894_v56  ;;  %v1926_v24 = vrot.slane %v1525_v36, %v3894_v56 }
 0x1e9   :  { %v1302_v62 = vpop.xlane.xlu1 %1301  ;;  %v1430_v43 = vpop.xlane.xlu0 %1429 }
 0x1ea   :  { %v2243_v21 = vsel %vm1841_vm12, %v2242_v37, %v2238_v35  ;;  %v1927_v18 = vsel %vm1841_vm12, %v1926_v24, %v1922_v52  ;;  %v1528_v8 = vadd.f32 %v3670_v60, %v1302_v62  ;;  %v1592_v25 = vadd.f32 %v3670_v60, %v1430_v43 }
 0x1ec   :  { %v1941_v38 = vrot.slane %v1528_v8, %v3883_v30  ;;  %v2257_v48 = vrot.slane %v1592_v25, %v3883_v30 }
 0x1ed   :  { %v1298_v33 = vpop.xlane.xlu1 %1297  ;;  %v1426_v2 = vpop.xlane.xlu0 %1425 }
 0x1ee   :  { %v1526_v45 = vadd.f32 %v3670_v60, %v1298_v33  ;;  %v1590_v14 = vadd.f32 %v3670_v60, %v1426_v2 }
 0x1f0   :  { %v1931_v17 = vrot.slane %v1526_v45, %v3891_v27  ;;  %v2247_v10 = vrot.slane %v1590_v14, %v3891_v27 }
 0x1f1   :  { %v1432_v15 = vpop.xlane.xlu1 %1431  ;;  %v1308_v55 = vpop.xlane.xlu0 %1307 }
 0x1f2   :  { %v1932_v50 = vsel %vm1848_vm13, %v1931_v17, %v1927_v18  ;;  %v2248_v7 = vsel %vm1848_vm13, %v2247_v10, %v2243_v21  ;;  %v1531_v31 = vadd.f32 %v3670_v60, %v1308_v55  ;;  %v1593_v36 = vadd.f32 %v3670_v60, %v1432_v15 }
 0x1f3   :  { %v1937_v28 = vsel %vm1855_vm14, %v1936_v49, %v1932_v50  ;;  %v2253_v51 = vsel %vm1855_vm14, %v2252_v32, %v2248_v7 }
 0x1f4   :  { %v1942_v26 = vsel %vm1862_vm15, %v1941_v38, %v1937_v28  ;;  %v4093_v9 = vsel %vm1862_vm15, %v2257_v48, %v2253_v51  ;;  %v1955_v35 = vrot.slane %v1531_v31, %v3673_v63  ;;  %v2262_v19 = vrot.slane %v1593_v36, %v3680_v42 }
 0x1f5   :  { %v4096_v3 = vsel %vm2417_vm0, %v1942_v26, %v3927_v57  ;;  %v1310_v4 = vpop.xlane.xlu1 %1309  ;;  %v1436_v0 = vpop.xlane.xlu0 %1435  ;;  %vm2419_vm0 = vcmask 1042434  }
 0x1f6   :  { %v1532_v23 = vadd.f32 %v3670_v60, %v1310_v4  ;;  %v1595_v24 = vadd.f32 %v3670_v60, %v1436_v0 }
 0x1f8   :  { %v1960_v34 = vrot.slane %v1532_v23, %v3676_v40  ;;  %v2271_v2 = vrot.slane %v1595_v24, %v3673_v63 }
 0x1f9   :  { %v1306_v61 = vpop.xlane.xlu1 %1305  ;;  %v1304_v16 = vpop.xlane.xlu0 %1303 }
 0x1fa   :  { %v1530_v22 = vadd.f32 %v3670_v60, %v1306_v61  ;;  %v1529_v1 = vadd.f32 %v3670_v60, %v1304_v16 }
 0x1fc   :  { %v1950_v47 = vrot.slane %v1530_v22, %v3683_v58  ;;  %v1946_v53 = vrot.slane %v1529_v1, %v3680_v42 }
 0x1fd   :  { %v1444_v57 = vpop.xlane.xlu1 %1443  ;;  %v1438_v52 = vpop.xlane.xlu0 %1437 }
 0x1fe   :  { %v1951_v11 = vsel %vm1764_vm1, %v1950_v47, %v1946_v53  ;;  %v1596_v21 = vadd.f32 %v3670_v60, %v1438_v52  ;;  %v1599_v22 = vadd.f32 %v3670_v60, %v1444_v57 }
 0x1ff   :  { %v1956_v46 = vsel %vm1771_vm2, %v1955_v35, %v1951_v11 }
 0x200   :  { %v1961_v37 = vsel %vm1778_vm3, %v1960_v34, %v1956_v46  ;;  %v2276_v45 = vrot.slane %v1596_v21, %v3676_v40  ;;  %v2291_v46 = vrot.slane %v1599_v22, %v3744_v39 }
 0x201   :  { %v1440_v62 = vpop.xlane.xlu1 %1439  ;;  %v1434_v43 = vpop.xlane.xlu0 %1433 }
 0x202   :  { %v1594_v18 = vadd.f32 %v3670_v60, %v1434_v43  ;;  %v1597_v54 = vadd.f32 %v3670_v60, %v1440_v62 }
 0x204   :  { %v2266_v33 = vrot.slane %v1594_v18, %v3683_v58  ;;  %v2281_v17 = vrot.slane %v1597_v54, %v3750_v13 }
 0x205   :  { %v1318_v8 = vpop.xlane.xlu1 %1317  ;;  %v1316_v25 = vpop.xlane.xlu0 %1315 }
 0x206   :  { %v2267_v14 = vsel %vm1764_vm1, %v2266_v33, %v2262_v19  ;;  %v1535_v38 = vadd.f32 %v3670_v60, %v1316_v25  ;;  %v1536_v7 = vadd.f32 %v3670_v60, %v1318_v8 }
 0x207   :  { %v2272_v10 = vsel %vm1771_vm2, %v2271_v2, %v2267_v14 }
 0x208   :  { %v2277_v32 = vsel %vm1778_vm3, %v2276_v45, %v2272_v10  ;;  %v1975_v0 = vrot.slane %v1535_v38, %v3744_v39  ;;  %v1980_v61 = vrot.slane %v1536_v7, %v3741_v59 }
 0x209   :  { %v1314_v49 = vpop.xlane.xlu1 %1313  ;;  %v1312_v15 = vpop.xlane.xlu0 %1311  ;;  %v2282_v55 = vsel %vm1785_vm4, %v2281_v17, %v2277_v32 }
 0x20a   :  { %v1534_v48 = vadd.f32 %v3670_v60, %v1314_v49  ;;  %v1533_v50 = vadd.f32 %v3670_v60, %v1312_v15 }
 0x20c   :  { %v1970_v28 = vrot.slane %v1534_v48, %v3747_v12  ;;  %v1965_v51 = vrot.slane %v1533_v50, %v3750_v13 }
 0x20d   :  { %v1452_v26 = vpop.xlane.xlu1 %1451  ;;  %v1446_v4 = vpop.xlane.xlu0 %1445 }
 0x20e   :  { %v1966_v31 = vsel %vm1785_vm4, %v1965_v51, %v1961_v37  ;;  %v1600_v35 = vadd.f32 %v3670_v60, %v1446_v4  ;;  %v1603_v48 = vadd.f32 %v3670_v60, %v1452_v26 }
 0x20f   :  { %v1971_v16 = vsel %vm1792_vm5, %v1970_v28, %v1966_v31 }
 0x210   :  { %v1976_v23 = vsel %vm1799_vm6, %v1975_v0, %v1971_v16  ;;  %v2296_v24 = vrot.slane %v1600_v35, %v3741_v59 }
 0x211   :  { %v1448_v1 = vpop.xlane.xlu1 %1447  ;;  %v1442_v47 = vpop.xlane.xlu0 %1441  ;;  %v1981_v53 = vsel %vm1806_vm7, %v1980_v61, %v1976_v23  ;;  %v2311_v61 = vrot.slane %v1603_v48, %v3822_v29 }
 0x212   :  { %v1598_v52 = vadd.f32 %v3670_v60, %v1442_v47  ;;  %v1601_v34 = vadd.f32 %v3670_v60, %v1448_v1 }
 0x214   :  { %v2286_v11 = vrot.slane %v1598_v52, %v3747_v12  ;;  %v2301_v62 = vrot.slane %v1601_v34, %v3828_v41 }
 0x215   :  { %v1326_v36 = vpop.xlane.xlu1 %1325  ;;  %v1324_v37 = vpop.xlane.xlu0 %1323 }
 0x216   :  { %v2287_v57 = vsel %vm1792_vm5, %v2286_v11, %v2282_v55  ;;  %v1539_v33 = vadd.f32 %v3670_v60, %v1324_v37  ;;  %v1540_v25 = vadd.f32 %v3670_v60, %v1326_v36 }
 0x217   :  { %v2292_v43 = vsel %vm1799_vm6, %v2291_v46, %v2287_v57 }
 0x218   :  { %v2297_v21 = vsel %vm1806_vm7, %v2296_v24, %v2292_v43  ;;  %v1995_v32 = vrot.slane %v1539_v33, %v3822_v29  ;;  %v2000_v15 = vrot.slane %v1540_v25, %v3816_v20 }
 0x219   :  { %v1322_v18 = vpop.xlane.xlu1 %1321  ;;  %v1320_v54 = vpop.xlane.xlu0 %1319  ;;  %v2302_v19 = vsel %vm1813_vm8, %v2301_v62, %v2297_v21 }
 0x21a   :  { %v1538_v2 = vadd.f32 %v3670_v60, %v1322_v18  ;;  %v1537_v8 = vadd.f32 %v3670_v60, %v1320_v54 }
 0x21c   :  { %v1990_v45 = vrot.slane %v1538_v2, %v3825_v5  ;;  %v1985_v14 = vrot.slane %v1537_v8, %v3828_v41 }
 0x21d   :  { %v1460_v17 = vpop.xlane.xlu1 %1459  ;;  %v1454_v10 = vpop.xlane.xlu0 %1453 }
 0x21e   :  { %v1986_v49 = vsel %vm1813_vm8, %v1985_v14, %v1981_v53  ;;  %v1604_v51 = vadd.f32 %v3670_v60, %v1454_v10  ;;  %v1607_v62 = vadd.f32 %v3670_v60, %v1460_v17 }
 0x21f   :  { %v1991_v55 = vsel %vm1820_vm9, %v1990_v45, %v1986_v49 }
 0x220   :  { %v1996_v38 = vsel %vm1827_vm10, %v1995_v32, %v1991_v55  ;;  %v2316_v22 = vrot.slane %v1604_v51, %v3816_v20  ;;  %v2331_v45 = vrot.slane %v1607_v62, %v3888_v6 }
 0x221   :  { %v1456_v50 = vpop.xlane.xlu1 %1455  ;;  %v1450_v7 = vpop.xlane.xlu0 %1449  ;;  %v2001_v28 = vsel %vm1834_vm11, %v2000_v15, %v1996_v38 }
 0x222   :  { %v1602_v4 = vadd.f32 %v3670_v60, %v1450_v7  ;;  %v1605_v0 = vadd.f32 %v3670_v60, %v1456_v50 }
 0x224   :  { %v2306_v31 = vrot.slane %v1602_v4, %v3825_v5  ;;  %v2321_v1 = vrot.slane %v1605_v0, %v3894_v56 }
 0x225   :  { %v1334_v16 = vpop.xlane.xlu1 %1333  ;;  %v1332_v23 = vpop.xlane.xlu0 %1331 }
 0x226   :  { %v2307_v26 = vsel %vm1820_vm9, %v2306_v31, %v2302_v19  ;;  %v1543_v11 = vadd.f32 %v3670_v60, %v1332_v23  ;;  %v1544_v37 = vadd.f32 %v3670_v60, %v1334_v16 }
 0x227   :  { %v2312_v47 = vsel %vm1827_vm10, %v2311_v61, %v2307_v26 }
 0x228   :  { %v2317_v53 = vsel %vm1834_vm11, %v2316_v22, %v2312_v47  ;;  %v2015_v18 = vrot.slane %v1543_v11, %v3888_v6  ;;  %v2020_v33 = vrot.slane %v1544_v37, %v3883_v30 }
 0x229   :  { %v1330_v35 = vpop.xlane.xlu1 %1329  ;;  %v1328_v52 = vpop.xlane.xlu0 %1327  ;;  %v2322_v34 = vsel %vm1841_vm12, %v2321_v1, %v2317_v53 }
 0x22a   :  { %v1542_v46 = vadd.f32 %v3670_v60, %v1330_v35  ;;  %v1541_v36 = vadd.f32 %v3670_v60, %v1328_v52 }
 0x22c   :  { %v2010_v24 = vrot.slane %v1542_v46, %v3891_v27  ;;  %v2005_v57 = vrot.slane %v1541_v36, %v3894_v56 }
 0x22d   :  { %v1468_v43 = vpop.xlane.xlu1 %1467  ;;  %v1458_v21 = vpop.xlane.xlu0 %1457 }
 0x22e   :  { %v2006_v54 = vsel %vm1841_vm12, %v2005_v57, %v2001_v28  ;;  %v1606_v19 = vadd.f32 %v3670_v60, %v1458_v21  ;;  %v1611_v52 = vadd.f32 %v3670_v60, %v1468_v43 }
 0x22f   :  { %v2011_v2 = vsel %vm1848_vm13, %v2010_v24, %v2006_v54 }
 0x230   :  { %v2016_v8 = vsel %vm1855_vm14, %v2015_v18, %v2011_v2  ;;  %v2326_v25 = vrot.slane %v1606_v19, %v3891_v27  ;;  %v2350_v18 = vrot.slane %v1611_v52, %v3673_v63 }
 0x231   :  { %v2021_v14 = vsel %vm1862_vm15, %v2020_v33, %v2016_v8  ;;  %v1464_v17 = vpop.xlane.xlu1 %1463  ;;  %v1340_v10 = vpop.xlane.xlu0 %1339 }
 0x232   :  { %v2327_v32 = vsel %vm1848_vm13, %v2326_v25, %v2322_v34  ;;  %v4189_v49 = vsel %vm2419_vm0, %v2021_v14, %v4096_v3  ;;  %v1609_v22 = vadd.f32 %v3670_v60, %v1464_v17  ;;  %v1547_v34 = vadd.f32 %v3670_v60, %v1340_v10 }
 0x233   :  { %v4192_v15 = vsel %vm1855_vm14, %v2331_v45, %v2327_v32 }
 0x234   :  { %v2341_v11 = vrot.slane %v1609_v22, %v3680_v42  ;;  %v2034_v54 = vrot.slane %v1547_v34, %v3673_v63 }
 0x235   :  { %v1342_v55 = vpop.xlane.xlu1 %1341  ;;  %v1336_v38 = vpop.xlane.xlu0 %1335 }
 0x236   :  { %v1545_v26 = vadd.f32 %v3670_v60, %v1336_v38  ;;  %v1548_v36 = vadd.f32 %v3670_v60, %v1342_v55 }
 0x238   :  { %v2025_v46 = vrot.slane %v1545_v26, %v3680_v42  ;;  %v2039_v14 = vrot.slane %v1548_v36, %v3676_v40 }
 0x239   :  { %v1338_v48 = vpop.xlane.xlu1 %1337  ;;  %v1470_v50 = vpop.xlane.xlu0 %1469 }
 0x23a   :  { %v1546_v23 = vadd.f32 %v3670_v60, %v1338_v48  ;;  %v1612_v21 = vadd.f32 %v3670_v60, %v1470_v50 }
 0x23c   :  { %v2029_v53 = vrot.slane %v1546_v23, %v3683_v58  ;;  %v2355_v17 = vrot.slane %v1612_v21, %v3676_v40 }
 0x23d   :  { %v1476_v7 = vpop.xlane.xlu1 %1475  ;;  %v1466_v28 = vpop.xlane.xlu0 %1465 }
 0x23e   :  { %v1610_v3 = vadd.f32 %v3670_v60, %v1466_v28  ;;  %v2030_v62 = vsel %vm1764_vm1, %v2029_v53, %v2025_v46  ;;  %v1615_v50 = vadd.f32 %v3670_v60, %v1476_v7 }
 0x23f   :  { %v2035_v33 = vsel %vm1771_vm2, %v2034_v54, %v2030_v62 }
 0x240   :  { %v2345_v35 = vrot.slane %v1610_v3, %v3683_v58  ;;  %v2040_v38 = vsel %vm1778_vm3, %v2039_v14, %v2035_v33  ;;  %v2370_v22 = vrot.slane %v1615_v50, %v3744_v39 }
 0x241   :  { %v1472_v51 = vpop.xlane.xlu1 %1471  ;;  %v1348_v4 = vpop.xlane.xlu0 %1347 }
 0x242   :  { %v2346_v58 = vsel %vm1764_vm1, %v2345_v35, %v2341_v11  ;;  %v1613_v42 = vadd.f32 %v3670_v60, %v1472_v51  ;;  %v1551_v32 = vadd.f32 %v3670_v60, %v1348_v4  ;;  %vm2421_vm1 = vcmask 1043459  }
 0x243   :  { %v2351_v2 = vsel %vm1771_vm2, %v2350_v18, %v2346_v58  ;;  %vm2423_vm2 = vcmask 1044484  }
 0x244   :  { %v2360_v63 = vrot.slane %v1613_v42, %v3750_v13  ;;  %v2356_v55 = vsel %vm1778_vm3, %v2355_v17, %v2351_v2  ;;  %v2054_v3 = vrot.slane %v1551_v32, %v3744_v39  ;;  %vm2425_vm3 = vcmask 1045509  }
 0x245   :  { %v1350_v0 = vpop.xlane.xlu1 %1349  ;;  %v1344_v31 = vpop.xlane.xlu0 %1343 }
 0x246   :  { %v1549_v37 = vadd.f32 %v3670_v60, %v1344_v31  ;;  %v2361_v23 = vsel %vm1785_vm4, %v2360_v63, %v2356_v55 }
 0x248   :  { %v2044_v8 = vrot.slane %v1549_v37, %v3750_v13 }
 0x249   :  { %v1346_v61 = vpop.xlane.xlu1 %1345  ;;  %v1478_v16 = vpop.xlane.xlu0 %1477 }
 0x24a   :  { %v1550_v43 = vadd.f32 %v3670_v60, %v1346_v61  ;;  %v2045_v28 = vsel %vm1785_vm4, %v2044_v8, %v2040_v38  ;;  %v1552_v61 = vadd.f32 %v3670_v60, %v1350_v0  ;;  %vm2427_vm4 = vcmask 1046534  }
 0x24c   :  { %v2049_v10 = vrot.slane %v1550_v43, %v3747_v12  ;;  %v2059_v52 = vrot.slane %v1552_v61, %v3741_v59 }
 0x24d   :  { %v4198_v1 = vpop.xlane.xlu1 %1483  ;;  %v1474_v47 = vpop.xlane.xlu0 %1473 }
 0x24e   :  { %v1614_v19 = vadd.f32 %v3670_v60, %v1474_v47  ;;  %v2050_v13 = vsel %vm1792_vm5, %v2049_v10, %v2045_v28  ;;  %v1619_v54 = vadd.f32 %v3670_v60, %v4198_v1 }
 0x24f   :  { %v2055_v26 = vsel %vm1799_vm6, %v2054_v3, %v2050_v13 }
 0x250   :  { %v2365_v48 = vrot.slane %v1614_v19, %v3747_v12  ;;  %v1616_v12 = vadd.f32 %v3670_v60, %v1478_v16  ;;  %v2060_v36 = vsel %vm1806_vm7, %v2059_v52, %v2055_v26  ;;  %v2390_v1 = vrot.slane %v1619_v54, %v3822_v29 }
 0x251   :  { %v1480_v24 = vpop.xlane.xlu1 %1479  ;;  %v1356_v57 = vpop.xlane.xlu0 %1355 }
 0x252   :  { %v2366_v7 = vsel %vm1792_vm5, %v2365_v48, %v2361_v23  ;;  %v1617_v47 = vadd.f32 %v3670_v60, %v1480_v24  ;;  %v1555_v46 = vadd.f32 %v3670_v60, %v1356_v57  ;;  %v2375_v39 = vrot.slane %v1616_v12, %v3741_v59 }
 0x253   :  { %v2371_v16 = vsel %vm1799_vm6, %v2370_v22, %v2366_v7  ;;  %vm2429_vm5 = vcmask 1047559  }
 0x254   :  { %v2380_v37 = vrot.slane %v1617_v47, %v3828_v41  ;;  %v2376_v58 = vsel %vm1806_vm7, %v2375_v39, %v2371_v16  ;;  %v2074_v57 = vrot.slane %v1555_v46, %v3822_v29 }
 0x255   :  { %v1358_v25 = vpop.xlane.xlu1 %1357  ;;  %v1352_v45 = vpop.xlane.xlu0 %1351 }
 0x256   :  { %v1553_v51 = vadd.f32 %v3670_v60, %v1352_v45  ;;  %v1556_v59 = vadd.f32 %v3670_v60, %v1358_v25  ;;  %v2381_v42 = vsel %vm1813_vm8, %v2380_v37, %v2376_v58 }
 0x258   :  { %v2064_v0 = vrot.slane %v1553_v51, %v3828_v41  ;;  %v2079_v14 = vrot.slane %v1556_v59, %v3816_v20 }
 0x259   :  { %v1354_v31 = vpop.xlane.xlu1 %1353  ;;  %v1486_v40 = vpop.xlane.xlu0 %1485 }
 0x25a   :  { %v1554_v4 = vadd.f32 %v3670_v60, %v1354_v31  ;;  %v2065_v24 = vsel %vm1813_vm8, %v2064_v0, %v2060_v36  ;;  %v1620_v25 = vadd.f32 %v3670_v60, %v1486_v40 }
 0x25c   :  { %v2069_v34 = vrot.slane %v1554_v4, %v3825_v5  ;;  %v2395_v40 = vrot.slane %v1620_v25, %v3816_v20 }
 0x25d   :  { %v1488_v53 = vpop.xlane.xlu1 %1487  ;;  %v1482_v35 = vpop.xlane.xlu0 %1481 }
 0x25e   :  { %v1618_v11 = vadd.f32 %v3670_v60, %v1482_v35  ;;  %v2070_v43 = vsel %vm1820_vm9, %v2069_v34, %v2065_v24  ;;  %v1621_v32 = vadd.f32 %v3670_v60, %v1488_v53 }
 0x25f   :  { %v2075_v41 = vsel %vm1827_vm10, %v2074_v57, %v2070_v43 }
 0x260   :  { %v2385_v18 = vrot.slane %v1618_v11, %v3825_v5  ;;  %v2080_v38 = vsel %vm1834_vm11, %v2079_v14, %v2075_v41  ;;  %v2400_v20 = vrot.slane %v1621_v32, %v3894_v56 }
 0x261   :  { %v1366_v62 = vpop.xlane.xlu1 %1365  ;;  %v1364_v21 = vpop.xlane.xlu0 %1363 }
 0x262   :  { %v2386_v2 = vsel %vm1820_vm9, %v2385_v18, %v2381_v42  ;;  %v1559_v8 = vadd.f32 %v3670_v60, %v1364_v21  ;;  %v1560_v17 = vadd.f32 %v3670_v60, %v1366_v62 }
 0x263   :  { %v2391_v55 = vsel %vm1827_vm10, %v2390_v1, %v2386_v2 }
 0x264   :  { %v2094_v29 = vrot.slane %v1559_v8, %v3888_v6  ;;  %v2099_v61 = vrot.slane %v1560_v17, %v3883_v30  ;;  %v2396_v3 = vsel %vm1834_vm11, %v2395_v40, %v2391_v55 }
 0x265   :  { %v1362_v19 = vpop.xlane.xlu1 %1361  ;;  %v1360_v33 = vpop.xlane.xlu0 %1359  ;;  %v2401_v35 = vsel %vm1841_vm12, %v2400_v20, %v2396_v3 }
 0x266   :  { %v1558_v45 = vadd.f32 %v3670_v60, %v1362_v19  ;;  %v1557_v5 = vadd.f32 %v3670_v60, %v1360_v33 }
 0x268   :  { %v2089_v10 = vrot.slane %v1558_v45, %v3891_v27  ;;  %v2084_v63 = vrot.slane %v1557_v5, %v3894_v56 }
 0x269   :  { %v1462_v48 = vpop.xlane.xlu1 %1461  ;;  %v1490_v50 = vpop.xlane.xlu0 %1489 }
 0x26a   :  { %v2085_v28 = vsel %vm1841_vm12, %v2084_v63, %v2080_v38  ;;  %v1608_v51 = vadd.f32 %v3670_v60, %v1462_v48  ;;  %v1622_v31 = vadd.f32 %v3670_v60, %v1490_v50 }
 0x26b   :  { %v2090_v13 = vsel %vm1848_vm13, %v2089_v10, %v2085_v28 }
 0x26c   :  { %v2095_v4 = vsel %vm1855_vm14, %v2094_v29, %v2090_v13  ;;  %v2336_v23 = vrot.slane %v1608_v51, %v3883_v30  ;;  %v2405_v12 = vrot.slane %v1622_v31, %v3891_v27 }
 0x26d   :  { %v1494_v7 = vpop.xlane.xlu1 %1493  ;;  %v1492_v22 = vpop.xlane.xlu0 %1491  ;;  %v2100_v26 = vsel %vm1862_vm15, %v2099_v61, %v2095_v4 }
 0x26e   :  { %v1624_v47 = vadd.f32 %v3670_v60, %v1494_v7  ;;  %v1623_v0 = vadd.f32 %v3670_v60, %v1492_v22  ;;  %v2422_v53 = vsel %vm2421_vm1, %v2100_v26, %v4189_v49  ;;  %v2406_v56 = vsel %vm1848_vm13, %v2405_v12, %v2401_v35 }
 0x26f   :  { %v2424_v34 = vsel %vm2423_vm2, %v3943_v44, %v2422_v53  ;;  %v2337_v60 = vsel %vm1862_vm15, %v2336_v23, %v4192_v15 }
 0x270   :  { %v2415_v52 = vrot.slane %v1624_v47, %v3883_v30  ;;  %v2410_v27 = vrot.slane %v1623_v0, %v3888_v6  ;;  %v2426_v11 = vsel %vm2425_vm3, %v4093_v9, %v2424_v34 }
 0x271   :  { %v2428_v16 = vsel %vm2427_vm4, %v2337_v60, %v2426_v11 }
 0x272   :  { %v2411_v49 = vsel %vm1855_vm14, %v2410_v27, %v2406_v56 }
 0x273   :  { %v2416_v30 = vsel %vm1862_vm15, %v2415_v52, %v2411_v49 }
 0x274   :  { %v2430_v6 = vsel %vm2429_vm5, %v2416_v30, %v2428_v16 }
 0x275   :  { %2432 = vst [vmem:[#allocation3] sm:$0xff] %v2430_v6 }
 0x276   :  { %2733 = shalt.err (!%p2730_p4)
}
 0x277   :  { %s2734_s1 = scalar_lea.hbm %s4316_s5, 128 }
 0x278   :  { %p2735_p5 = scmp.ne.s32.totalorder %s4316_s5, %s2734_s1  ;;  %p2738_p6 = scmp.lt.u32.totalorder %s2734_s1, %s4316_s5 }
 0x27a   :  { %p2740_p7 = pnand %p2738_p6, %p2735_p5 }
 0x27c   :  { %2743 = shalt.err (!%p2740_p7)
}
 0x27d   :  { %2442 = dma.vmem_to_hbm [thread:$0]  %s2440_s25, 128, %s4316_s5, [#allocation4]  }
 0x27e   :  { %2744 = dma.done.wait [#allocation4], 128  }
 0x27f   :  { %2745 = vsyncadd [#allocation4], 4294967168 }
 0x280   :  { %2446 = vsyncpa [#allocation4], 1 }

</bundles_post_ra>
